<compile_context>
chip_gen: v7x
topology: tpu7x:2x2x1
jax: 0.10.0
libtpu: 0.0.40
codegen_flags: <defaults>
</compile_context>

<pallas_src>
import functools

import numpy as np
import jax
import jax.numpy as jnp
from jax.experimental import pallas as pl
from jax.experimental.pallas import tpu as pltpu

BN_EPS = 1e-5
_VMEM = pl.BlockSpec(memory_space=pltpu.MemorySpace.VMEM)


# ----------------------------- fused Pallas kernel -----------------------------

def _cvae_fused_kernel(x_ref, g_ref, eps_ref,
                       w1x_ref, w1g_ref, sh1_ref,
                       w2_ref, sh2_ref, w3_ref, sh3_ref,
                       wml_ref, bml_ref, wdz_ref, wdg_ref, bd_ref,
                       d1_ref, dsh1_ref, d2_ref, dsh2_ref, d3_ref, dsh3_ref,
                       recon_ref, ml_ref, *, latent):
    """Entire CVAE forward in one kernel.

    Every conv / transposed conv (+ folded BatchNorm, + output_padding/crop)
    is a dense NHWC-flat matrix prepared on the host, so each layer is one
    bf16 MXU matmul + f32 shift/activation epilogue; shortcut adds stay in
    f32 registers.  nn.Dropout2d layers are identity (eval mode).
    """
    f32, bf16 = jnp.float32, jnp.bfloat16
    silu = lambda v: v * jax.nn.sigmoid(v)

    x = x_ref[...].astype(bf16)          # (B, H0*W0)  spectrogram (1 channel)
    g = g_ref[...].astype(bf16)          # (B, n_genres) one-hot genre embedding

    # ---- encoder: Conv2d(k3,s2,p1)+BN(folded)+SiLU == matmul + shift + SiLU ----
    y1 = (jnp.dot(x, w1x_ref[...], preferred_element_type=f32)
          + jnp.dot(g, w1g_ref[...], preferred_element_type=f32)   # genre map is
          + sh1_ref[...])                                           # spatially const
    s1 = silu(y1)
    y2 = jnp.dot(s1.astype(bf16), w2_ref[...],
                 preferred_element_type=f32) + sh2_ref[...]
    s2 = silu(y2)
    y3 = jnp.dot(s2.astype(bf16), w3_ref[...],
                 preferred_element_type=f32) + sh3_ref[...]
    s3 = silu(y3)

    # ---- AdaptiveAvgPool2d((1,1)) + Flatten + [fc_mu | fc_logvar] (pool folded) ----
    ml = jnp.dot(s3.astype(bf16), wml_ref[...],
                 preferred_element_type=f32) + bml_ref[...]
    ml_ref[...] = ml
    mu = ml[:, :latent]
    logvar = ml[:, latent:]
    z = mu + eps_ref[...] * jnp.exp(0.5 * logvar)          # reparameterize

    # ---- decoder_input(z | genres); output pre-permuted to NHWC-flat layout ----
    h = (jnp.dot(z.astype(bf16), wdz_ref[...], preferred_element_type=f32)
         + jnp.dot(g, wdg_ref[...], preferred_element_type=f32)
         + bd_ref[...])

    # ---- decoder: shortcut add (f32) + ConvTranspose2d+BN(folded)+SiLU ----
    h = h + s3
    t = jnp.dot(h.astype(bf16), d1_ref[...],
                preferred_element_type=f32) + dsh1_ref[...]
    h = silu(t) + s2
    t = jnp.dot(h.astype(bf16), d2_ref[...],
                preferred_element_type=f32) + dsh2_ref[...]
    h = silu(t) + s1
    t = jnp.dot(h.astype(bf16), d3_ref[...],
                preferred_element_type=f32) + dsh3_ref[...]
    recon_ref[...] = jax.nn.sigmoid(t)                     # final Sigmoid (crop baked in)


# ------------------------ host-side weight preparation ------------------------

def _conv_matrix(w, H, W, stride=2, pad=1):
    """Dense matrix M with conv2d(x) == x_flat @ M per sample (NHWC-flat,
    position-major / channel-minor on both sides; bias excluded)."""
    Cout, Cin, kH, kW = w.shape
    Ho = (H + 2 * pad - kH) // stride + 1
    Wo = (W + 2 * pad - kW) // stride + 1
    M = np.zeros((H * W * Cin, Ho * Wo * Cout), np.float32)
    for i in range(Ho):
        for j in range(Wo):
            col = (i * Wo + j) * Cout
            for kh in range(kH):
                hi = i * stride + kh - pad
                if not 0 <= hi < H:
                    continue
                for kw in range(kW):
                    wi = j * stride + kw - pad
                    if not 0 <= wi < W:
                        continue
                    row = (hi * W + wi) * Cin
                    M[row:row + Cin, col:col + Cout] += w[:, :, kh, kw].T
    return M, Ho, Wo


def _deconv_matrix(w, H, W, keep_h, keep_w, stride=2, pad=1, out_pad=(0, 0)):
    """Dense matrix D with conv_transpose2d(x)[:, :, :keep_h, :keep_w] ==
    x_flat @ D per sample (NHWC-flat; bias excluded; crop folded in)."""
    Cin, Cout, kH, kW = w.shape
    Ho = (H - 1) * stride - 2 * pad + kH + out_pad[0]
    Wo = (W - 1) * stride - 2 * pad + kW + out_pad[1]
    Hk, Wk = min(Ho, keep_h), min(Wo, keep_w)
    D = np.zeros((H * W * Cin, Hk * Wk * Cout), np.float32)
    for hi in range(H):
        for wi in range(W):
            row = (hi * W + wi) * Cin
            for kh in range(kH):
                oi = hi * stride + kh - pad
                if not 0 <= oi < Hk:
                    continue
                for kw in range(kW):
                    oj = wi * stride + kw - pad
                    if not 0 <= oj < Wk:
                        continue
                    col = (oi * Wk + oj) * Cout
                    D[row:row + Cin, col:col + Cout] += w[:, :, kh, kw]
    return D, Hk, Wk


def prepare_params(params, *, d_model, latent_dim, n_frames, n_mels, n_genres):
    """One-time (outside jit) weight prep: conv/deconv -> dense NHWC-flat
    matrices with BN running stats folded in, pool folded into fc_mu|fc_logvar,
    decoder_input output permuted to the shortcut layout, crops / output_padding
    baked into matrix columns, MXU operands cast to bf16, shifts kept f32."""
    p = {k: np.asarray(v, np.float32) for k, v in params.items()}

    def fold_bn(M, cout, bn, bias):
        scale = p[f"{bn}_g"] / np.sqrt(p[f"{bn}_rv"] + BN_EPS)
        npos = M.shape[1] // cout
        Mf = (M.reshape(M.shape[0], npos, cout) * scale).reshape(M.shape)
        shift = np.tile(scale * (bias - p[f"{bn}_rm"]) + p[f"{bn}_b"], npos)
        return Mf, shift

    H0, W0 = n_frames, n_mels
    C1, C2, C3 = d_model, 2 * d_model, 4 * d_model

    # encoder convs
    M1, H1, W1 = _conv_matrix(p["conv1_w"], H0, W0)
    M1, sh1 = fold_bn(M1, C1, "bn1", p["conv1_b"])
    M1 = M1.reshape(H0 * W0, 1 + n_genres, -1)
    w1x = M1[:, 0, :]                     # spectrogram channel
    w1g = M1[:, 1:, :].sum(axis=0)        # genre channels are spatially constant
    M2, H2, W2 = _conv_matrix(p["conv2_w"], H1, W1)
    w2, sh2 = fold_bn(M2, C2, "bn2", p["conv2_b"])
    M3, H3, W3 = _conv_matrix(p["conv3_w"], H2, W2)
    w3, sh3 = fold_bn(M3, C3, "bn3", p["conv3_b"])
    assert H3 == int(np.ceil(n_frames / 8)) and W3 == int(np.ceil(n_mels / 8))

    # AdaptiveAvgPool2d((1,1)) + Flatten folded into [fc_mu | fc_logvar]
    npos3 = H3 * W3
    fc_cat = np.concatenate([p["fc_mu_w"], p["fc_lv_w"]], axis=0)   # (2L, C3)
    wml = np.tile(fc_cat.T / npos3, (npos3, 1))                     # (npos3*C3, 2L)
    bml = np.concatenate([p["fc_mu_b"], p["fc_lv_b"]])

    # decoder_input: permute its output to the same NHWC-flat layout as s3
    Dh = C3 * npos3
    assert p["dec_in_w"].shape[0] == Dh
    q = np.arange(Dh)
    perm = (q % C3) * npos3 + q // C3
    Wd = p["dec_in_w"][perm, :]
    wdz, wdg = Wd[:, :latent_dim].T, Wd[:, latent_dim:].T
    bd = p["dec_in_b"][perm]

    # decoder transposed convs (output_padding + final crop folded into columns)
    D1, Hd1, Wd1 = _deconv_matrix(p["dconv1_w"], H3, W3, H2, W2, out_pad=(1, 0))
    d1, dsh1 = fold_bn(D1, C2, "dbn1", p["dconv1_b"])
    D2, Hd2, Wd2 = _deconv_matrix(p["dconv2_w"], Hd1, Wd1, H1, W1, out_pad=(1, 0))
    d2, dsh2 = fold_bn(D2, C1, "dbn2", p["dconv2_b"])
    D3, Hd3, Wd3 = _deconv_matrix(p["dconv3_w"], Hd2, Wd2, H0, W0, out_pad=(1, 1))
    dsh3 = np.tile(p["dconv3_b"], Hd3 * Wd3)
    assert (Hd1, Wd1) == (H2, W2) and (Hd2, Wd2) == (H1, W1) \
        and (Hd3, Wd3) == (H0, W0), \
        "decoder shapes must match encoder shortcuts (pick n_frames/n_mels accordingly)"

    bf16, f32 = jnp.bfloat16, jnp.float32
    row = lambda a: jnp.asarray(np.asarray(a).reshape(1, -1), f32)
    return {
        "w1x": jnp.asarray(w1x, bf16), "w1g": jnp.asarray(w1g, bf16), "sh1": row(sh1),
        "w2": jnp.asarray(w2, bf16), "sh2": row(sh2),
        "w3": jnp.asarray(w3, bf16), "sh3": row(sh3),
        "wml": jnp.asarray(wml, bf16), "bml": row(bml),
        "wdz": jnp.asarray(wdz, bf16), "wdg": jnp.asarray(wdg, bf16), "bd": row(bd),
        "d1": jnp.asarray(d1, bf16), "dsh1": row(dsh1),
        "d2": jnp.asarray(d2, bf16), "dsh2": row(dsh2),
        "d3": jnp.asarray(D3, bf16), "dsh3": row(dsh3),
    }


# ------------------------------- forward -----------------------------------

def cvae_forward(prep, x, genres_input, eps, *, latent_dim):
    """Whole CVAE forward = one gridless pallas_call (everything fits in VMEM)."""
    B, _, H0, W0 = x.shape
    xf = x.reshape(B, H0 * W0)                      # NCHW with C=1 -> flat rows
    g = genres_input.reshape(B, -1)
    recon_flat, ml = pl.pallas_call(
        functools.partial(_cvae_fused_kernel, latent=latent_dim),
        out_shape=(jax.ShapeDtypeStruct((B, H0 * W0), jnp.float32),
                   jax.ShapeDtypeStruct((B, 2 * latent_dim), jnp.float32)),
        in_specs=[_VMEM] * 21,
        out_specs=(_VMEM, _VMEM),
    )(xf, g, eps,
      prep["w1x"], prep["w1g"], prep["sh1"],
      prep["w2"], prep["sh2"], prep["w3"], prep["sh3"],
      prep["wml"], prep["bml"], prep["wdz"], prep["wdg"], prep["bd"],
      prep["d1"], prep["dsh1"], prep["d2"], prep["dsh2"], prep["d3"], prep["dsh3"])
    recon = recon_flat.reshape(B, 1, H0, W0)
    return recon, ml[:, :latent_dim], ml[:, latent_dim:]


# ---------------------------- pure-JAX reference ----------------------------

def reference_forward(params, x, genres_input, eps, *, d_model):
    """Eval-mode reference of the PyTorch CVAE.forward using lax convolutions."""
    B, _, H0, W0 = x.shape
    g = genres_input.reshape(B, -1)
    gmap = jnp.broadcast_to(g[:, :, None, None], (B, g.shape[1], H0, W0))
    h = jnp.concatenate([x, gmap], axis=1)
    hi = "highest"

    def conv(v, w, b):
        o = jax.lax.conv_general_dilated(
            v, w, window_strides=(2, 2), padding=((1, 1), (1, 1)),
            dimension_numbers=("NCHW", "OIHW", "NCHW"), precision=hi)
        return o + b[None, :, None, None]

    def deconv(v, w, b, out_pad):
        wt = jnp.flip(w, axis=(2, 3)).transpose(1, 0, 2, 3)
        o = jax.lax.conv_general_dilated(
            v, wt, window_strides=(1, 1),
            padding=((1, 1 + out_pad[0]), (1, 1 + out_pad[1])),
            lhs_dilation=(2, 2),
            dimension_numbers=("NCHW", "OIHW", "NCHW"), precision=hi)
        return o + b[None, :, None, None]

    def bn(v, pre):
        sc = params[f"{pre}_g"] / jnp.sqrt(params[f"{pre}_rv"] + BN_EPS)
        return ((v - params[f"{pre}_rm"][None, :, None, None]) * sc[None, :, None, None]
                + params[f"{pre}_b"][None, :, None, None])

    silu = lambda v: v * jax.nn.sigmoid(v)

    shortcuts = []
    for i in (1, 2, 3):                                   # Dropout2d == identity
        h = silu(bn(conv(h, params[f"conv{i}_w"], params[f"conv{i}_b"]), f"bn{i}"))
        shortcuts.append(h)
    pooled = h.mean(axis=(2, 3))
    mu = jnp.dot(pooled, params["fc_mu_w"].T, precision=hi) + params["fc_mu_b"]
    logvar = jnp.dot(pooled, params["fc_lv_w"].T, precision=hi) + params["fc_lv_b"]
    z = mu + eps * jnp.exp(0.5 * logvar)
    zg = jnp.concatenate([z, g], axis=1)
    hd = jnp.dot(zg, params["dec_in_w"].T, precision=hi) + params["dec_in_b"]
    s3 = shortcuts[2]
    hd = hd.reshape(B, 4 * d_model, s3.shape[2], s3.shape[3]) + s3
    hd = silu(bn(deconv(hd, params["dconv1_w"], params["dconv1_b"], (1, 0)), "dbn1"))
    hd = hd + shortcuts[1]
    hd = silu(bn(deconv(hd, params["dconv2_w"], params["dconv2_b"], (1, 0)), "dbn2"))
    hd = hd + shortcuts[0]
    hd = jax.nn.sigmoid(deconv(hd, params["dconv3_w"], params["dconv3_b"], (1, 1)))
    return hd[:, :, :H0, :W0], mu, logvar


# ------------------------------ parameters ---------------------------------

def init_params(key, d_model, latent_dim, n_frames, n_mels, n_genres):
    nf = int(np.ceil(n_frames / 8))
    nm = int(np.ceil(n_mels / 8))
    D = d_model * 4 * nf * nm
    shapes = {
        "conv1_w": (d_model, 1 + n_genres, 3, 3), "conv1_b": (d_model,),
        "bn1_g": (d_model,), "bn1_b": (d_model,),
        "conv2_w": (2 * d_model, d_model, 3, 3), "conv2_b": (2 * d_model,),
        "bn2_g": (2 * d_model,), "bn2_b": (2 * d_model,),
        "conv3_w": (4 * d_model, 2 * d_model, 3, 3), "conv3_b": (4 * d_model,),
        "bn3_g": (4 * d_model,), "bn3_b": (4 * d_model,),
        "fc_mu_w": (latent_dim, 4 * d_model), "fc_mu_b": (latent_dim,),
        "fc_lv_w": (latent_dim, 4 * d_model), "fc_lv_b": (latent_dim,),
        "dec_in_w": (D, latent_dim + n_genres), "dec_in_b": (D,),
        "dconv1_w": (4 * d_model, 2 * d_model, 3, 3), "dconv1_b": (2 * d_model,),
        "dbn1_g": (2 * d_model,), "dbn1_b": (2 * d_model,),
        "dconv2_w": (2 * d_model, d_model, 3, 3), "dconv2_b": (d_model,),
        "dbn2_g": (d_model,), "dbn2_b": (d_model,),
        "dconv3_w": (d_model, 1, 3, 3), "dconv3_b": (1,),
    }
    params = {}
    keys = jax.random.split(key, len(shapes))
    for (name, shp), k in zip(shapes.items(), keys):
        if ("bn" in name) and name.endswith("_g"):
            params[name] = (jnp.ones(shp, jnp.float32)
                            + 0.05 * jax.random.normal(k, shp, jnp.float32))
        elif ("bn" in name) and name.endswith("_b"):
            params[name] = 0.05 * jax.random.normal(k, shp, jnp.float32)
        else:
            fan_in = int(np.prod(shp[1:])) if len(shp) > 1 else int(shp[0])
            params[name] = ((0.5 / np.sqrt(fan_in))
                            * jax.random.normal(k, shp, jnp.float32))
    # BatchNorm running statistics (eval mode uses these; fresh module values).
    for n, c in (("bn1", d_model), ("bn2", 2 * d_model), ("bn3", 4 * d_model),
                 ("dbn1", 2 * d_model), ("dbn2", d_model)):
        params[f"{n}_rm"] = jnp.zeros((c,), jnp.float32)
        params[f"{n}_rv"] = jnp.ones((c,), jnp.float32)
    return params


# --------------------------------- main -------------------------------------

if __name__ == "__main__":
    d_model, latent_dim, n_genres = 8, 4, 5
    # n_frames / n_mels chosen so the module's decoder shortcut additions are
    # shape-consistent (as required by the PyTorch forward).
    n_frames, n_mels = 16, 10
    B = 2

    key = jax.random.PRNGKey(0)
    kp, kx, kg, ke = jax.random.split(key, 4)
    params = init_params(kp, d_model, latent_dim, n_frames, n_mels, n_genres)
    prep = prepare_params(params, d_model=d_model, latent_dim=latent_dim,
                          n_frames=n_frames, n_mels=n_mels, n_genres=n_genres)

    x = jax.random.uniform(kx, (B, 1, n_frames, n_mels), jnp.float32)
    genres_input = jax.nn.one_hot(
        jax.random.randint(kg, (B,), 0, n_genres), n_genres, dtype=jnp.float32)
    eps = jax.random.normal(ke, (B, latent_dim), jnp.float32)

    fwd = jax.jit(functools.partial(cvae_forward, latent_dim=latent_dim))
    recon, mu, logvar = fwd(prep, x, genres_input, eps)
    jax.block_until_ready((recon, mu, logvar))

    assert recon.shape == (B, 1, n_frames, n_mels), recon.shape
    assert mu.shape == (B, latent_dim) and logvar.shape == (B, latent_dim)
    assert bool(jnp.all(jnp.isfinite(recon)))
    assert bool(jnp.all(jnp.isfinite(mu))) and bool(jnp.all(jnp.isfinite(logvar)))

    # Pure-JAX reference of the PyTorch forward (same eps); bf16 weights and
    # activations in the kernel -> ~1e-2 level agreement expected.
    recon_r, mu_r, logvar_r = reference_forward(
        params, x, genres_input, eps, d_model=d_model)
    np.testing.assert_allclose(np.asarray(mu), np.asarray(mu_r),
                               rtol=2e-2, atol=2e-2)
    np.testing.assert_allclose(np.asarray(logvar), np.asarray(logvar_r),
                               rtol=2e-2, atol=2e-2)
    np.testing.assert_allclose(np.asarray(recon), np.asarray(recon_r),
                               rtol=2e-2, atol=2e-2)
    print("KERNEL_OK")
</pallas_src>

<mosaic_0001>
module attributes {stable_mosaic.version = 11 : i64} {
  func.func @_cvae_fused_kernel(%arg0: memref<2x160xf32, #tpu.memory_space<vmem>>, %arg1: memref<2x5xf32, #tpu.memory_space<vmem>>, %arg2: memref<2x4xf32, #tpu.memory_space<vmem>>, %arg3: memref<160x320xbf16, #tpu.memory_space<vmem>>, %arg4: memref<5x320xbf16, #tpu.memory_space<vmem>>, %arg5: memref<1x320xf32, #tpu.memory_space<vmem>>, %arg6: memref<320x192xbf16, #tpu.memory_space<vmem>>, %arg7: memref<1x192xf32, #tpu.memory_space<vmem>>, %arg8: memref<192x128xbf16, #tpu.memory_space<vmem>>, %arg9: memref<1x128xf32, #tpu.memory_space<vmem>>, %arg10: memref<128x8xbf16, #tpu.memory_space<vmem>>, %arg11: memref<1x8xf32, #tpu.memory_space<vmem>>, %arg12: memref<4x128xbf16, #tpu.memory_space<vmem>>, %arg13: memref<5x128xbf16, #tpu.memory_space<vmem>>, %arg14: memref<1x128xf32, #tpu.memory_space<vmem>>, %arg15: memref<128x192xbf16, #tpu.memory_space<vmem>>, %arg16: memref<1x192xf32, #tpu.memory_space<vmem>>, %arg17: memref<192x320xbf16, #tpu.memory_space<vmem>>, %arg18: memref<1x320xf32, #tpu.memory_space<vmem>>, %arg19: memref<320x160xbf16, #tpu.memory_space<vmem>>, %arg20: memref<1x160xf32, #tpu.memory_space<vmem>>, %arg21: memref<2x160xf32, #tpu.memory_space<vmem>>, %arg22: memref<2x8xf32, #tpu.memory_space<vmem>>) attributes {dimension_semantics = [], scalar_prefetch = 0 : i64, scratch_operands = 0 : i64, tpu.core_type = #tpu.core_type<tc>} {
    %c0 = arith.constant 0 : index
    %c0_0 = arith.constant 0 : index
    %0 = vector.load %arg0[%c0, %c0_0] : memref<2x160xf32, #tpu.memory_space<vmem>>, vector<2x160xf32>
    %1 = arith.truncf %0 : vector<2x160xf32> to vector<2x160xbf16>
    %c0_1 = arith.constant 0 : index
    %c0_2 = arith.constant 0 : index
    %2 = vector.load %arg1[%c0_1, %c0_2] : memref<2x5xf32, #tpu.memory_space<vmem>>, vector<2x5xf32>
    %3 = arith.truncf %2 : vector<2x5xf32> to vector<2x5xbf16>
    %c0_3 = arith.constant 0 : index
    %c0_4 = arith.constant 0 : index
    %4 = vector.load %arg3[%c0_3, %c0_4] : memref<160x320xbf16, #tpu.memory_space<vmem>>, vector<160x320xbf16>
    %cst = arith.constant dense<0.000000e+00> : vector<2x320xf32>
    %5 = tpu.matmul %1, %4, %cst {dimension_numbers = #tpu.dot_dimension_numbers<[1], [0], [0], [1], [0, 0, 1, 1], [], []>} : vector<2x160xbf16>, vector<160x320xbf16>, vector<2x320xf32> -> vector<2x320xf32>
    %c0_5 = arith.constant 0 : index
    %c0_6 = arith.constant 0 : index
    %6 = vector.load %arg4[%c0_5, %c0_6] : memref<5x320xbf16, #tpu.memory_space<vmem>>, vector<5x320xbf16>
    %cst_7 = arith.constant dense<0.000000e+00> : vector<2x320xf32>
    %7 = tpu.matmul %3, %6, %cst_7 {dimension_numbers = #tpu.dot_dimension_numbers<[1], [0], [0], [1], [0, 0, 1, 1], [], []>} : vector<2x5xbf16>, vector<5x320xbf16>, vector<2x320xf32> -> vector<2x320xf32>
    %8 = arith.addf %5, %7 : vector<2x320xf32>
    %c0_8 = arith.constant 0 : index
    %c0_9 = arith.constant 0 : index
    %9 = vector.load %arg5[%c0_8, %c0_9] : memref<1x320xf32, #tpu.memory_space<vmem>>, vector<1x320xf32>
    %10 = vector.broadcast %9 : vector<1x320xf32> to vector<2x320xf32>
    %11 = arith.addf %8, %10 : vector<2x320xf32>
    %12 = arith.negf %11 : vector<2x320xf32>
    %13 = math.exp %12 : vector<2x320xf32>
    %cst_10 = arith.constant 1.000000e+00 : f32
    %14 = vector.broadcast %cst_10 : f32 to vector<2x320xf32>
    %15 = arith.addf %14, %13 : vector<2x320xf32>
    %16 = arith.divf %14, %15 : vector<2x320xf32>
    %17 = arith.mulf %11, %16 : vector<2x320xf32>
    %18 = arith.truncf %17 : vector<2x320xf32> to vector<2x320xbf16>
    %c0_11 = arith.constant 0 : index
    %c0_12 = arith.constant 0 : index
    %19 = vector.load %arg6[%c0_11, %c0_12] : memref<320x192xbf16, #tpu.memory_space<vmem>>, vector<320x192xbf16>
    %cst_13 = arith.constant dense<0.000000e+00> : vector<2x192xf32>
    %20 = tpu.matmul %18, %19, %cst_13 {dimension_numbers = #tpu.dot_dimension_numbers<[1], [0], [0], [1], [0, 0, 1, 1], [], []>} : vector<2x320xbf16>, vector<320x192xbf16>, vector<2x192xf32> -> vector<2x192xf32>
    %c0_14 = arith.constant 0 : index
    %c0_15 = arith.constant 0 : index
    %21 = vector.load %arg7[%c0_14, %c0_15] : memref<1x192xf32, #tpu.memory_space<vmem>>, vector<1x192xf32>
    %22 = vector.broadcast %21 : vector<1x192xf32> to vector<2x192xf32>
    %23 = arith.addf %20, %22 : vector<2x192xf32>
    %24 = arith.negf %23 : vector<2x192xf32>
    %25 = math.exp %24 : vector<2x192xf32>
    %cst_16 = arith.constant 1.000000e+00 : f32
    %26 = vector.broadcast %cst_16 : f32 to vector<2x192xf32>
    %27 = arith.addf %26, %25 : vector<2x192xf32>
    %28 = arith.divf %26, %27 : vector<2x192xf32>
    %29 = arith.mulf %23, %28 : vector<2x192xf32>
    %30 = arith.truncf %29 : vector<2x192xf32> to vector<2x192xbf16>
    %c0_17 = arith.constant 0 : index
    %c0_18 = arith.constant 0 : index
    %31 = vector.load %arg8[%c0_17, %c0_18] : memref<192x128xbf16, #tpu.memory_space<vmem>>, vector<192x128xbf16>
    %cst_19 = arith.constant dense<0.000000e+00> : vector<2x128xf32>
    %32 = tpu.matmul %30, %31, %cst_19 {dimension_numbers = #tpu.dot_dimension_numbers<[1], [0], [0], [1], [0, 0, 1, 1], [], []>} : vector<2x192xbf16>, vector<192x128xbf16>, vector<2x128xf32> -> vector<2x128xf32>
    %c0_20 = arith.constant 0 : index
    %c0_21 = arith.constant 0 : index
    %33 = vector.load %arg9[%c0_20, %c0_21] : memref<1x128xf32, #tpu.memory_space<vmem>>, vector<1x128xf32>
    %34 = vector.broadcast %33 : vector<1x128xf32> to vector<2x128xf32>
    %35 = arith.addf %32, %34 : vector<2x128xf32>
    %36 = arith.negf %35 : vector<2x128xf32>
    %37 = math.exp %36 : vector<2x128xf32>
    %cst_22 = arith.constant 1.000000e+00 : f32
    %38 = vector.broadcast %cst_22 : f32 to vector<2x128xf32>
    %39 = arith.addf %38, %37 : vector<2x128xf32>
    %40 = arith.divf %38, %39 : vector<2x128xf32>
    %41 = arith.mulf %35, %40 : vector<2x128xf32>
    %42 = arith.truncf %41 : vector<2x128xf32> to vector<2x128xbf16>
    %c0_23 = arith.constant 0 : index
    %c0_24 = arith.constant 0 : index
    %43 = vector.load %arg10[%c0_23, %c0_24] : memref<128x8xbf16, #tpu.memory_space<vmem>>, vector<128x8xbf16>
    %cst_25 = arith.constant dense<0.000000e+00> : vector<2x8xf32>
    %44 = tpu.matmul %42, %43, %cst_25 {dimension_numbers = #tpu.dot_dimension_numbers<[1], [0], [0], [1], [0, 0, 1, 1], [], []>} : vector<2x128xbf16>, vector<128x8xbf16>, vector<2x8xf32> -> vector<2x8xf32>
    %c0_26 = arith.constant 0 : index
    %c0_27 = arith.constant 0 : index
    %45 = vector.load %arg11[%c0_26, %c0_27] : memref<1x8xf32, #tpu.memory_space<vmem>>, vector<1x8xf32>
    %46 = vector.broadcast %45 : vector<1x8xf32> to vector<2x8xf32>
    %47 = arith.addf %44, %46 : vector<2x8xf32>
    %c0_28 = arith.constant 0 : index
    %c0_29 = arith.constant 0 : index
    %48 = vector.load %arg22[%c0_28, %c0_29] : memref<2x8xf32, #tpu.memory_space<vmem>>, vector<2x8xf32>
    tpu.vector_store %arg22[%c0_28, %c0_29], %47 {strides = array<i32>} : memref<2x8xf32, #tpu.memory_space<vmem>>, vector<2x8xf32>,
    %49 = vector.extract_strided_slice %47 {offsets = [0, 0], sizes = [2, 4], strides = [1, 1]} : vector<2x8xf32> to vector<2x4xf32>
    %50 = vector.extract_strided_slice %47 {offsets = [0, 4], sizes = [2, 4], strides = [1, 1]} : vector<2x8xf32> to vector<2x4xf32>
    %c0_30 = arith.constant 0 : index
    %c0_31 = arith.constant 0 : index
    %51 = vector.load %arg2[%c0_30, %c0_31] : memref<2x4xf32, #tpu.memory_space<vmem>>, vector<2x4xf32>
    %cst_32 = arith.constant 5.000000e-01 : f32
    %52 = vector.broadcast %cst_32 : f32 to vector<2x4xf32>
    %53 = arith.mulf %52, %50 : vector<2x4xf32>
    %54 = math.exp %53 : vector<2x4xf32>
    %55 = arith.mulf %51, %54 : vector<2x4xf32>
    %56 = arith.addf %49, %55 : vector<2x4xf32>
    %57 = arith.truncf %56 : vector<2x4xf32> to vector<2x4xbf16>
    %c0_33 = arith.constant 0 : index
    %c0_34 = arith.constant 0 : index
    %58 = vector.load %arg12[%c0_33, %c0_34] : memref<4x128xbf16, #tpu.memory_space<vmem>>, vector<4x128xbf16>
    %cst_35 = arith.constant dense<0.000000e+00> : vector<2x128xf32>
    %59 = tpu.matmul %57, %58, %cst_35 {dimension_numbers = #tpu.dot_dimension_numbers<[1], [0], [0], [1], [0, 0, 1, 1], [], []>} : vector<2x4xbf16>, vector<4x128xbf16>, vector<2x128xf32> -> vector<2x128xf32>
    %c0_36 = arith.constant 0 : index
    %c0_37 = arith.constant 0 : index
    %60 = vector.load %arg13[%c0_36, %c0_37] : memref<5x128xbf16, #tpu.memory_space<vmem>>, vector<5x128xbf16>
    %cst_38 = arith.constant dense<0.000000e+00> : vector<2x128xf32>
    %61 = tpu.matmul %3, %60, %cst_38 {dimension_numbers = #tpu.dot_dimension_numbers<[1], [0], [0], [1], [0, 0, 1, 1], [], []>} : vector<2x5xbf16>, vector<5x128xbf16>, vector<2x128xf32> -> vector<2x128xf32>
    %62 = arith.addf %59, %61 : vector<2x128xf32>
    %c0_39 = arith.constant 0 : index
    %c0_40 = arith.constant 0 : index
    %63 = vector.load %arg14[%c0_39, %c0_40] : memref<1x128xf32, #tpu.memory_space<vmem>>, vector<1x128xf32>
    %64 = vector.broadcast %63 : vector<1x128xf32> to vector<2x128xf32>
    %65 = arith.addf %62, %64 : vector<2x128xf32>
    %66 = arith.addf %65, %41 : vector<2x128xf32>
    %67 = arith.truncf %66 : vector<2x128xf32> to vector<2x128xbf16>
    %c0_41 = arith.constant 0 : index
    %c0_42 = arith.constant 0 : index
    %68 = vector.load %arg15[%c0_41, %c0_42] : memref<128x192xbf16, #tpu.memory_space<vmem>>, vector<128x192xbf16>
    %cst_43 = arith.constant dense<0.000000e+00> : vector<2x192xf32>
    %69 = tpu.matmul %67, %68, %cst_43 {dimension_numbers = #tpu.dot_dimension_numbers<[1], [0], [0], [1], [0, 0, 1, 1], [], []>} : vector<2x128xbf16>, vector<128x192xbf16>, vector<2x192xf32> -> vector<2x192xf32>
    %c0_44 = arith.constant 0 : index
    %c0_45 = arith.constant 0 : index
    %70 = vector.load %arg16[%c0_44, %c0_45] : memref<1x192xf32, #tpu.memory_space<vmem>>, vector<1x192xf32>
    %71 = vector.broadcast %70 : vector<1x192xf32> to vector<2x192xf32>
    %72 = arith.addf %69, %71 : vector<2x192xf32>
    %73 = arith.negf %72 : vector<2x192xf32>
    %74 = math.exp %73 : vector<2x192xf32>
    %cst_46 = arith.constant 1.000000e+00 : f32
    %75 = vector.broadcast %cst_46 : f32 to vector<2x192xf32>
    %76 = arith.addf %75, %74 : vector<2x192xf32>
    %77 = arith.divf %75, %76 : vector<2x192xf32>
    %78 = arith.mulf %72, %77 : vector<2x192xf32>
    %79 = arith.addf %78, %29 : vector<2x192xf32>
    %80 = arith.truncf %79 : vector<2x192xf32> to vector<2x192xbf16>
    %c0_47 = arith.constant 0 : index
    %c0_48 = arith.constant 0 : index
    %81 = vector.load %arg17[%c0_47, %c0_48] : memref<192x320xbf16, #tpu.memory_space<vmem>>, vector<192x320xbf16>
    %cst_49 = arith.constant dense<0.000000e+00> : vector<2x320xf32>
    %82 = tpu.matmul %80, %81, %cst_49 {dimension_numbers = #tpu.dot_dimension_numbers<[1], [0], [0], [1], [0, 0, 1, 1], [], []>} : vector<2x192xbf16>, vector<192x320xbf16>, vector<2x320xf32> -> vector<2x320xf32>
    %c0_50 = arith.constant 0 : index
    %c0_51 = arith.constant 0 : index
    %83 = vector.load %arg18[%c0_50, %c0_51] : memref<1x320xf32, #tpu.memory_space<vmem>>, vector<1x320xf32>
    %84 = vector.broadcast %83 : vector<1x320xf32> to vector<2x320xf32>
    %85 = arith.addf %82, %84 : vector<2x320xf32>
    %86 = arith.negf %85 : vector<2x320xf32>
    %87 = math.exp %86 : vector<2x320xf32>
    %cst_52 = arith.constant 1.000000e+00 : f32
    %88 = vector.broadcast %cst_52 : f32 to vector<2x320xf32>
    %89 = arith.addf %88, %87 : vector<2x320xf32>
    %90 = arith.divf %88, %89 : vector<2x320xf32>
    %91 = arith.mulf %85, %90 : vector<2x320xf32>
    %92 = arith.addf %91, %17 : vector<2x320xf32>
    %93 = arith.truncf %92 : vector<2x320xf32> to vector<2x320xbf16>
    %c0_53 = arith.constant 0 : index
    %c0_54 = arith.constant 0 : index
    %94 = vector.load %arg19[%c0_53, %c0_54] : memref<320x160xbf16, #tpu.memory_space<vmem>>, vector<320x160xbf16>
    %cst_55 = arith.constant dense<0.000000e+00> : vector<2x160xf32>
    %95 = tpu.matmul %93, %94, %cst_55 {dimension_numbers = #tpu.dot_dimension_numbers<[1], [0], [0], [1], [0, 0, 1, 1], [], []>} : vector<2x320xbf16>, vector<320x160xbf16>, vector<2x160xf32> -> vector<2x160xf32>
    %c0_56 = arith.constant 0 : index
    %c0_57 = arith.constant 0 : index
    %96 = vector.load %arg20[%c0_56, %c0_57] : memref<1x160xf32, #tpu.memory_space<vmem>>, vector<1x160xf32>
    %97 = vector.broadcast %96 : vector<1x160xf32> to vector<2x160xf32>
    %98 = arith.addf %95, %97 : vector<2x160xf32>
    %99 = arith.negf %98 : vector<2x160xf32>
    %100 = math.exp %99 : vector<2x160xf32>
    %cst_58 = arith.constant 1.000000e+00 : f32
    %101 = vector.broadcast %cst_58 : f32 to vector<2x160xf32>
    %102 = arith.addf %101, %100 : vector<2x160xf32>
    %103 = arith.divf %101, %102 : vector<2x160xf32>
    %c0_59 = arith.constant 0 : index
    %c0_60 = arith.constant 0 : index
    %104 = vector.load %arg21[%c0_59, %c0_60] : memref<2x160xf32, #tpu.memory_space<vmem>>, vector<2x160xf32>
    tpu.vector_store %arg21[%c0_59, %c0_60], %103 {strides = array<i32>} : memref<2x160xf32, #tpu.memory_space<vmem>>, vector<2x160xf32>,
    return
  }
}

</mosaic_0001>

<bundles_post_ra>
// kernel: cvae_forward.1
= control target key start
LH: loop header
LB: loop body
LE: loop exit
PB: predicated region body
PF: predicated region fallthrough
CT: control target
= control target key end

     0   :  { %vm141_vm0 = vcmask 1041408   ;;  %vm142_vm1 = vcmask 1042432   ;;  %v2757_v0 = vmov 0.0   ;;  %v2758_v2 = vmov 65535   ;;  %s2761_s26 = smov 124   ;;  %s3608_s4 = inlined_call_operand.vmem [shape: bf16[5,320], index: 4, kind: input, shape index: {}]   ;;  %s3609_s1 = inlined_call_operand.vmem [shape: f32[2,5], index: 1, kind: input, shape index: {}]   ;;  %s3610_s3 = inlined_call_operand.vmem [shape: bf16[160,320], index: 3, kind: input, shape index: {}]   ;;  %s3611_s0 = inlined_call_operand.vmem [shape: f32[2,160], index: 0, kind: input, shape index: {}]   ;;  %s3612_s6 = inlined_call_operand.vmem [shape: bf16[320,192], index: 6, kind: input, shape index: {}]   ;;  %s3613_s8 = inlined_call_operand.vmem [shape: bf16[192,128], index: 8, kind: input, shape index: {}]   ;;  %s3614_s5 = inlined_call_operand.vmem [shape: f32[1,320], index: 5, kind: input, shape index: {}]   ;;  %s3615_s7 = inlined_call_operand.vmem [shape: f32[1,192], index: 7, kind: input, shape index: {}]   ;;  %s3616_s10 = inlined_call_operand.vmem [shape: bf16[128,8], index: 10, kind: input, shape index: {}]   ;;  %s3617_s9 = inlined_call_operand.vmem [shape: f32[1,128], index: 9, kind: input, shape index: {}]   ;;  %s3618_s13 = inlined_call_operand.vmem [shape: bf16[5,128], index: 13, kind: input, shape index: {}]   ;;  %s3619_s12 = inlined_call_operand.vmem [shape: bf16[4,128], index: 12, kind: input, shape index: {}]   ;;  %s3620_s11 = inlined_call_operand.vmem [shape: f32[1,8], index: 11, kind: input, shape index: {}]   ;;  %s3621_s22 = inlined_call_operand.vmem [shape: f32[2,8], index: 22, kind: output, shape index: {1}]   ;;  %s3622_s15 = inlined_call_operand.vmem [shape: bf16[128,192], index: 15, kind: input, shape index: {}]   ;;  %s3623_s2 = inlined_call_operand.vmem [shape: f32[2,4], index: 2, kind: input, shape index: {}]   ;;  %s3624_s17 = inlined_call_operand.vmem [shape: bf16[192,320], index: 17, kind: input, shape index: {}]   ;;  %s3625_s14 = inlined_call_operand.vmem [shape: f32[1,128], index: 14, kind: input, shape index: {}]   ;;  %s3626_s19 = inlined_call_operand.vmem [shape: bf16[320,160], index: 19, kind: input, shape index: {}]   ;;  %s3627_s16 = inlined_call_operand.vmem [shape: f32[1,192], index: 16, kind: input, shape index: {}]   ;;  %s3628_s18 = inlined_call_operand.vmem [shape: f32[1,320], index: 18, kind: input, shape index: {}]   ;;  %s3629_s20 = inlined_call_operand.vmem [shape: f32[1,160], index: 20, kind: input, shape index: {}]   ;;  %s3630_s21 = inlined_call_operand.vmem [shape: f32[2,160], index: 21, kind: output, shape index: {0}]  }
   0x1   :  { %3635 = sst [smem:[#allocation2_spill]] %s3608_s4  ;;  %2392 = vmatprep.subr.bf16.mxu1 %v2757_v0  ;;  %v143_v3 = vsel %vm141_vm0, 4294967295, %v2758_v2  ;;  %v2759_v8 = vmov 0   ;;  %vm2760_vm2 = vmmov 0   ;;  %vm137_vm3 = vcmask 39936  }
   0x2   :  { %3636 = sst [smem:[#allocation3_spill]] %s3609_s1  ;;  %s3642_s29 = sld [smem:[#allocation2_spill]]  ;;  %v2883_v5 = vsel %vm142_vm1, %v143_v3, 0  ;;  %186 = vmatprep.mubr.bf16.mxu0 %v2759_v8  ;;  %2394 = vmatprep.mubr.msk.bf16.mxu1 %vm2760_vm2, %v2757_v0  ;;  %vm395_vm4 = vcmask 261120   ;;  %vm776_vm5 = vcmask 523264   ;;  %vm1143_vm6 = vcmask 58368  }
   0x3   :  { %3637 = sst [smem:[#allocation4_spill]] %s3610_s3  ;;  %s3643_s1 = sld [smem:[#allocation3_spill]]  ;;  %vm1201_vm7 = vcmask 31744   ;;  %vm2153_vm8 = vcmask 257026  }
   0x4   :  { %3638 = sst [smem:[#allocation5_spill]] %s3611_s0  ;;  %vm2154_vm9 = vmor %vm2153_vm8, %vm141_vm0 }
   0x5   :  { %3639 = sst [smem:[#allocation6_spill]] %s3612_s6 }
   0x6   :  { %3640 = sst [smem:[#allocation7_spill]] %s3613_s8  ;;  %s3646_s30 = sld [smem:[#allocation6_spill]] }
   0x7   :  { %3641 = sst [smem:[#allocation8_spill]] %s3614_s5  ;;  %s3644_s5 = sld [smem:[#allocation4_spill]] }
   0x8   :  { %v127_v1 = vld [vmem:[%s3642_s29] sm:$0x77]  ;;  %v2449_v6 = vld [vmem:[%s3642_s29 + $0x8] ss:$0 sps:$4 sm:$0x77]   ;;  %s3645_s29 = sld [smem:[#allocation5_spill]] }
   0x9   :  { %v2166_v4 = vcombine.high %v127_v1, %v127_v1  ;;  %v2165_v7 = vcombine.low %v127_v1, %v127_v1  ;;  %v85_v9 = vld [vmem:[%s3643_s1] sm:$0x3]  ;;  %v152_v11 = vand.u32 %v2449_v6, %v2883_v5  ;;  %s3647_s27 = sld [smem:[#allocation7_spill]]  ;;  %s3648_s1 = sld [smem:[#allocation8_spill]] }
   0xa   :  { %v2900_v14 = vpack.c.bf16 %v85_v9, %v85_v9 }
   0xb   :  { %v149_v10 = vand.u32 %v2166_v4, %v2883_v5  ;;  %v146_v12 = vand.u32 %v2165_v7, %v2883_v5  ;;  %2393 = vmatpush3.bf16.msra.mxu1 %v152_v11 }
   0xc   :  { %440 = vmatprep.subr.bf16.mxu1 %v2759_v8  ;;  %v2491_v48 = vld [vmem:[%s3646_s30] ss:$8 sps:$4 sm:$0xff]   ;;  %v2493_v49 = vld [vmem:[%s3646_s30 + $0x4] ss:$8 sps:$4 sm:$0xff]   ;;  %v2496_v50 = vld [vmem:[%s3646_s30 + $0x14] ss:$8 sps:$4 sm:$0xff]  }
   0xd   :  { %v2453_v13 = vld [vmem:[%s3644_s5 + $0x4] ss:$12 sps:$4 sm:$0xff]   ;;  %154 = vmatprep.subr.bf16.mxu0 %v149_v10  ;;  %v2454_v15 = vld [vmem:[%s3644_s5 + $0x8] ss:$12 sps:$4 sm:$0xff]   ;;  %v2451_v16 = vld [vmem:[%s3644_s5] ss:$12 sps:$4 sm:$0xff]  }
   0xe   :  { %155 = vmatpush1.bf16.msra.mxu0 %v146_v12  ;;  %v2457_v17 = vld [vmem:[%s3644_s5 + $0x1c] ss:$12 sps:$4 sm:$0xff]   ;;  %2395 = vmatmul.mubr.msk.bf16.vlgmr.msra.gmra.mrb[0].mxu1 %vm137_vm3, %v2900_v14  ;;  %v2458_v18 = vld [vmem:[%s3644_s5 + $0x20] ss:$12 sps:$4 sm:$0xff]   ;;  %v2455_v19 = vld [vmem:[%s3644_s5 + $0x18] ss:$12 sps:$4 sm:$0xff]  }
   0xf   :  { %399 = vmatprep.subr.bf16.mxu0 %v2453_v13  ;;  %441 = vmatpush1.bf16.msra.mxu1 %v2454_v15  ;;  %v2461_v20 = vld [vmem:[%s3644_s5 + $0x34] ss:$12 sps:$4 sm:$0xff]   ;;  %v2462_v21 = vld [vmem:[%s3644_s5 + $0x38] ss:$12 sps:$4 sm:$0xff]   ;;  %v2459_v22 = vld [vmem:[%s3644_s5 + $0x30] ss:$12 sps:$4 sm:$0xff]  }
  0x10   :  { %442 = vmatprep.subr.bf16.mxu1 %v2759_v8  ;;  %v2465_v23 = vld [vmem:[%s3644_s5 + $0x4c] ss:$12 sps:$4 sm:$0xff]   ;;  %v2466_v24 = vld [vmem:[%s3644_s5 + $0x50] ss:$12 sps:$4 sm:$0xff]   ;;  %v2463_v25 = vld [vmem:[%s3644_s5 + $0x48] ss:$12 sps:$4 sm:$0xff]  }
  0x11   :  { %2168 = vmatmul.mubr.msk.bf16.vlgmr.msra.gmra.mrb[0].mxu0 %vm137_vm3, %v2900_v14  ;;  %v2469_v26 = vld [vmem:[%s3644_s5 + $0x64] ss:$12 sps:$4 sm:$0xff]   ;;  %v2470_v27 = vld [vmem:[%s3644_s5 + $0x68] ss:$12 sps:$4 sm:$0xff]   ;;  %v2467_v28 = vld [vmem:[%s3644_s5 + $0x60] ss:$12 sps:$4 sm:$0xff]  }
  0x12   :  { %400 = vmatpush1.bf16.msra.mxu0 %v2451_v16  ;;  %v2473_v29 = vld [vmem:[%s3644_s5 + $0x7c] ss:$12 sps:$4 sm:$0xff]   ;;  %v2474_v30 = vld [vmem:[%s3644_s5 + $0x80] ss:$12 sps:$4 sm:$0xff]   ;;  %v2471_v32 = vld [vmem:[%s3644_s5 + $0x78] ss:$12 sps:$4 sm:$0xff]  }
  0x13   :  { %401 = vmatprep.subr.bf16.mxu0 %v2457_v17  ;;  %443 = vmatpush1.bf16.msra.mxu1 %v2458_v18  ;;  %v2164_v31 = vld.sshfl [vmem:[%s3645_s29] sm:$0x33 pattern:$0x76325410]  ;;  %v2478_v36 = vld [vmem:[%s3644_s5 + $0x98] ss:$12 sps:$4 sm:$0xff]  }
  0x14   :  { %444 = vmatprep.subr.bf16.mxu1 %v2759_v8  ;;  %v80_v33 = vcombine.high %v2164_v31, %v2164_v31  ;;  %v2477_v34 = vld [vmem:[%s3644_s5 + $0x94] ss:$12 sps:$4 sm:$0xff]   ;;  %v2475_v37 = vld [vmem:[%s3644_s5 + $0x90] ss:$12 sps:$4 sm:$0xff]   ;;  %v2481_v38 = vld [vmem:[%s3644_s5 + $0xac] ss:$12 sps:$4 sm:$0xff]   ;;  %v83_v47 = vpack.c.bf16 %v2164_v31, %v2164_v31 }
  0x15   :  { %v2482_v39 = vld [vmem:[%s3644_s5 + $0xb0] ss:$12 sps:$4 sm:$0xff]   ;;  %v2479_v40 = vld [vmem:[%s3644_s5 + $0xa8] ss:$12 sps:$4 sm:$0xff]   ;;  %v2483_v43 = vld [vmem:[%s3644_s5 + $0xc0] ss:$12 sps:$4 sm:$0xff]  }
  0x16   :  { %402 = vmatpush1.bf16.msra.mxu0 %v2455_v19  ;;  %v84_v35 = vpack.c.bf16 %v80_v33, %v80_v33  ;;  %v2485_v41 = vld [vmem:[%s3644_s5 + $0xc4] ss:$12 sps:$4 sm:$0xff]   ;;  %v2486_v42 = vld [vmem:[%s3644_s5 + $0xc8] ss:$12 sps:$4 sm:$0xff]   ;;  %v2490_v45 = vld [vmem:[%s3644_s5 + $0xe0] ss:$12 sps:$4 sm:$0xff]  }
  0x17   :  { %403 = vmatprep.subr.bf16.mxu0 %v2461_v20  ;;  %445 = vmatpush1.bf16.msra.mxu1 %v2462_v21  ;;  %v2489_v44 = vld [vmem:[%s3644_s5 + $0xdc] ss:$12 sps:$4 sm:$0xff]   ;;  %v2487_v46 = vld [vmem:[%s3644_s5 + $0xd8] ss:$12 sps:$4 sm:$0xff]  }
  0x18   :  { %446 = vmatprep.subr.bf16.mxu1 %v2759_v8  ;;  %2201 = vmatprep.mubr.msk.bf16.mxu1 %vm395_vm4, %v84_v35  ;;  %v2494_v51 = vld [vmem:[%s3646_s30 + $0x10] ss:$8 sps:$4 sm:$0xff]   ;;  %v2499_v52 = vld [vmem:[%s3646_s30 + $0x24] ss:$8 sps:$4 sm:$0xff]   ;;  %v2497_v53 = vld [vmem:[%s3646_s30 + $0x20] ss:$8 sps:$4 sm:$0xff]  }
  0x19   :  { %2200 = vmatprep.mubr.msk.bf16.mxu0 %vm395_vm4, %v84_v35  ;;  %v2502_v54 = vld [vmem:[%s3646_s30 + $0x34] ss:$8 sps:$4 sm:$0xff]   ;;  %v2500_v55 = vld [vmem:[%s3646_s30 + $0x30] ss:$8 sps:$4 sm:$0xff]   ;;  %v2505_v56 = vld [vmem:[%s3646_s30 + $0x44] ss:$8 sps:$4 sm:$0xff]  }
  0x1a   :  { %404 = vmatpush1.bf16.msra.mxu0 %v2459_v22  ;;  %v2503_v57 = vld [vmem:[%s3646_s30 + $0x40] ss:$8 sps:$4 sm:$0xff]   ;;  %v2508_v58 = vld [vmem:[%s3646_s30 + $0x54] ss:$8 sps:$4 sm:$0xff]   ;;  %v2506_v59 = vld [vmem:[%s3646_s30 + $0x50] ss:$8 sps:$4 sm:$0xff]  }
  0x1b   :  { %405 = vmatprep.subr.bf16.mxu0 %v2465_v23  ;;  %447 = vmatpush1.bf16.msra.mxu1 %v2466_v24  ;;  %v2511_v60 = vld [vmem:[%s3646_s30 + $0x64] ss:$8 sps:$4 sm:$0xff]   ;;  %v2509_v61 = vld [vmem:[%s3646_s30 + $0x60] ss:$8 sps:$4 sm:$0xff]   ;;  %v2514_v62 = vld [vmem:[%s3646_s30 + $0x74] ss:$8 sps:$4 sm:$0xff]  }
  0x1c   :  { %448 = vmatprep.subr.bf16.mxu1 %v2759_v8  ;;  %v2512_v63 = vld [vmem:[%s3646_s30 + $0x70] ss:$8 sps:$4 sm:$0xff]   ;;  %v2517_v1 = vld [vmem:[%s3646_s30 + $0x84] ss:$8 sps:$4 sm:$0xff]   ;;  %v2515_v2 = vld [vmem:[%s3646_s30 + $0x80] ss:$8 sps:$4 sm:$0xff]  }
  0x1d   :  { %v2520_v3 = vld [vmem:[%s3646_s30 + $0x94] ss:$8 sps:$4 sm:$0xff]   ;;  %v2518_v4 = vld [vmem:[%s3646_s30 + $0x90] ss:$8 sps:$4 sm:$0xff]   ;;  %v2523_v6 = vld [vmem:[%s3646_s30 + $0xa4] ss:$8 sps:$4 sm:$0xff]  }
  0x1e   :  { %406 = vmatpush1.bf16.msra.mxu0 %v2463_v25  ;;  %v2521_v7 = vld [vmem:[%s3646_s30 + $0xa0] ss:$8 sps:$4 sm:$0xff]   ;;  %v2526_v9 = vld [vmem:[%s3646_s30 + $0xb4] ss:$8 sps:$4 sm:$0xff]   ;;  %v2524_v10 = vld [vmem:[%s3646_s30 + $0xb0] ss:$8 sps:$4 sm:$0xff]  }
  0x1f   :  { %407 = vmatprep.subr.bf16.mxu0 %v2469_v26  ;;  %449 = vmatpush1.bf16.msra.mxu1 %v2470_v27  ;;  %v2529_v11 = vld [vmem:[%s3646_s30 + $0xc4] ss:$8 sps:$4 sm:$0xff]   ;;  %v2527_v12 = vld [vmem:[%s3646_s30 + $0xc0] ss:$8 sps:$4 sm:$0xff]   ;;  %v2532_v13 = vld [vmem:[%s3646_s30 + $0xd4] ss:$8 sps:$4 sm:$0xff]  }
  0x20   :  { %450 = vmatprep.subr.bf16.mxu1 %v2759_v8  ;;  %v2530_v15 = vld [vmem:[%s3646_s30 + $0xd0] ss:$8 sps:$4 sm:$0xff]   ;;  %v2535_v16 = vld [vmem:[%s3646_s30 + $0xe4] ss:$8 sps:$4 sm:$0xff]   ;;  %v2533_v17 = vld [vmem:[%s3646_s30 + $0xe0] ss:$8 sps:$4 sm:$0xff]  }
  0x21   :  { %v2538_v18 = vld [vmem:[%s3646_s30 + $0xf4] ss:$8 sps:$4 sm:$0xff]   ;;  %v2536_v19 = vld [vmem:[%s3646_s30 + $0xf0] ss:$8 sps:$4 sm:$0xff]   ;;  %v2541_v20 = vld [vmem:[%s3646_s30 + $0x104] ss:$8 sps:$4 sm:$0xff]  }
  0x22   :  { %408 = vmatpush1.bf16.msra.mxu0 %v2467_v28  ;;  %v2551_v21 = vld [vmem:[%s3647_s27] sm:$0xff]   ;;  %v2552_v22 = vld [vmem:[%s3647_s27 + $0x8] sm:$0xff]   ;;  %v2553_v23 = vld [vmem:[%s3647_s27 + $0x10] sm:$0xff]  }
  0x23   :  { %409 = vmatprep.subr.bf16.mxu0 %v2473_v29  ;;  %451 = vmatpush1.bf16.msra.mxu1 %v2474_v30 }
  0x24   :  { %452 = vmatprep.subr.bf16.mxu1 %v2759_v8 }
  0x26   :  { %410 = vmatpush1.bf16.msra.mxu0 %v2471_v32  ;;  %v482_v32 = vlaneseq }
  0x27   :  { %411 = vmatprep.subr.bf16.mxu0 %v2477_v34  ;;  %453 = vmatpush1.bf16.msra.mxu1 %v2478_v36  ;;  %v480_v36 = vld [vmem:[%s3648_s1] sm:$0x7] }
  0x28   :  { %454 = vmatprep.subr.bf16.mxu1 %v2759_v8  ;;  %v3118_v33 = vshrl.u32 %v482_v32, 7 }
  0x2a   :  { %412 = vmatpush1.bf16.msra.mxu0 %v2475_v37  ;;  %v3121_v34 = vsub.s32 0, %v3118_v33  ;;  %v3124_v35 = vsub.s32 1, %v3118_v33 }
  0x2b   :  { %413 = vmatprep.subr.bf16.mxu0 %v2481_v38  ;;  %455 = vmatpush1.bf16.msra.mxu1 %v2482_v39 }
  0x2c   :  { %456 = vmatprep.subr.bf16.mxu1 %v2759_v8  ;;  %v485_v38 = vrot.slane %v480_v36, %v3121_v34 }
  0x2e   :  { %414 = vmatpush1.bf16.msra.mxu0 %v2479_v40 }
  0x2f   :  { %415 = vmatprep.subr.bf16.mxu0 %v2485_v41  ;;  %457 = vmatpush1.bf16.msra.mxu1 %v2486_v42  ;;  %v489_v41 = vrot.slane %v480_v36, %v3124_v35 }
  0x30   :  { %458 = vmatprep.subr.bf16.mxu1 %v2759_v8 }
  0x32   :  { %416 = vmatpush1.bf16.msra.mxu0 %v2483_v43  ;;  %v492_v43 = vsub.s32 2, %v3118_v33 }
  0x33   :  { %417 = vmatprep.subr.bf16.mxu0 %v2489_v44  ;;  %459 = vmatpush1.bf16.msra.mxu1 %v2490_v45 }
  0x34   :  { %984 = vmatprep.subr.bf16.mxu1 %v2759_v8 }
  0x36   :  { %418 = vmatpush1.bf16.msra.mxu0 %v2487_v46  ;;  %473 = vmatmul.mubr.bf16.vlgmr.msra.gmra.mrb[4].mxu1 %v83_v47 }
  0x37   :  { %780 = vmatprep.subr.bf16.mxu0 %v2493_v49  ;;  %985 = vmatpush1.bf16.msra.mxu1 %v2551_v21  ;;  %v2555_v21 = vld [vmem:[%s3647_s27 + $0x20] sm:$0xff]  }
  0x38   :  { %986 = vmatprep.subr.bf16.mxu1 %v2759_v8 }
  0x39   :  { %432 = vmatmul.mubr.bf16.vlgmr.msra.gmra.mrb[4].mxu0 %v83_v47 }
  0x3a   :  { %781 = vmatpush1.bf16.msra.mxu0 %v2491_v48 }
  0x3b   :  { %782 = vmatprep.subr.bf16.mxu0 %v2496_v50  ;;  %987 = vmatpush1.bf16.msra.mxu1 %v2552_v22  ;;  %v2556_v22 = vld [vmem:[%s3647_s27 + $0x28] sm:$0xff]  }
  0x3c   :  { %988 = vmatprep.subr.bf16.mxu1 %v2759_v8 }
  0x3e   :  { %783 = vmatpush1.bf16.msra.mxu0 %v2494_v51 }
  0x3f   :  { %784 = vmatprep.subr.bf16.mxu0 %v2499_v52  ;;  %989 = vmatpush1.bf16.msra.mxu1 %v2553_v23  ;;  %v2557_v23 = vld [vmem:[%s3647_s27 + $0x30] sm:$0xff]  }
  0x40   :  { %990 = vmatprep.subr.bf16.mxu1 %v2759_v8 }
  0x42   :  { %785 = vmatpush1.bf16.msra.mxu0 %v2497_v53  ;;  %v493_v53 = vrot.slane %v480_v36, %v492_v43 }
  0x43   :  { %786 = vmatprep.subr.bf16.mxu0 %v2502_v54 }
  0x46   :  { %787 = vmatpush1.bf16.msra.mxu0 %v2500_v55 }
  0x47   :  { %788 = vmatprep.subr.bf16.mxu0 %v2505_v56 }
  0x4a   :  { %789 = vmatpush1.bf16.msra.mxu0 %v2503_v57 }
  0x4b   :  { %790 = vmatprep.subr.bf16.mxu0 %v2508_v58 }
  0x4e   :  { %791 = vmatpush1.bf16.msra.mxu0 %v2506_v59 }
  0x4f   :  { %792 = vmatprep.subr.bf16.mxu0 %v2511_v60 }
  0x52   :  { %793 = vmatpush1.bf16.msra.mxu0 %v2509_v61 }
  0x53   :  { %794 = vmatprep.subr.bf16.mxu0 %v2514_v62 }
  0x56   :  { %795 = vmatpush1.bf16.msra.mxu0 %v2512_v63 }
  0x57   :  { %796 = vmatprep.subr.bf16.mxu0 %v2517_v1 }
  0x5a   :  { %797 = vmatpush1.bf16.msra.mxu0 %v2515_v2 }
  0x5b   :  { %798 = vmatprep.subr.bf16.mxu0 %v2520_v3 }
  0x5e   :  { %799 = vmatpush1.bf16.msra.mxu0 %v2518_v4 }
  0x5f   :  { %800 = vmatprep.subr.bf16.mxu0 %v2523_v6 }
  0x62   :  { %801 = vmatpush1.bf16.msra.mxu0 %v2521_v7  ;;  %v2539_v7 = vld [vmem:[%s3646_s30 + $0x100] ss:$8 sps:$4 sm:$0xff]  }
  0x63   :  { %802 = vmatprep.subr.bf16.mxu0 %v2526_v9 }
  0x66   :  { %803 = vmatpush1.bf16.msra.mxu0 %v2524_v10  ;;  %v2544_v10 = vld [vmem:[%s3646_s30 + $0x114] ss:$8 sps:$4 sm:$0xff]  }
  0x67   :  { %804 = vmatprep.subr.bf16.mxu0 %v2529_v11  ;;  %v2542_v11 = vld [vmem:[%s3646_s30 + $0x110] ss:$8 sps:$4 sm:$0xff]  }
  0x6a   :  { %805 = vmatpush1.bf16.msra.mxu0 %v2527_v12  ;;  %v2547_v12 = vld [vmem:[%s3646_s30 + $0x124] ss:$8 sps:$4 sm:$0xff]  }
  0x6b   :  { %806 = vmatprep.subr.bf16.mxu0 %v2532_v13  ;;  %v2545_v13 = vld [vmem:[%s3646_s30 + $0x120] ss:$8 sps:$4 sm:$0xff]  }
  0x6e   :  { %807 = vmatpush1.bf16.msra.mxu0 %v2530_v15  ;;  %v2550_v15 = vld [vmem:[%s3646_s30 + $0x134] ss:$8 sps:$4 sm:$0xff]  }
  0x6f   :  { %808 = vmatprep.subr.bf16.mxu0 %v2535_v16 }
  0x72   :  { %809 = vmatpush1.bf16.msra.mxu0 %v2533_v17  ;;  %v2548_v17 = vld [vmem:[%s3646_s30 + $0x130] ss:$8 sps:$4 sm:$0xff]  }
  0x73   :  { %810 = vmatprep.subr.bf16.mxu0 %v2538_v18 }
  0x76   :  { %811 = vmatpush1.bf16.msra.mxu0 %v2536_v19 }
  0x77   :  { %821 = vmatprep.subr.bf16.mxu0 %v2541_v20  ;;  %v2554_v20 = vld [vmem:[%s3647_s27 + $0x18] sm:$0xff]  }
  0x78   :  { %991 = vmatpush1.bf16.msra.mxu1 %v2554_v20 }
  0x79   :  { %992 = vmatprep.subr.bf16.mxu1 %v2759_v8 }
  0x7c   :  { %993 = vmatpush1.bf16.msra.mxu1 %v2555_v21 }
  0x7d   :  { %994 = vmatprep.subr.bf16.mxu1 %v2759_v8 }
  0x80   :  { %995 = vmatpush1.bf16.msra.mxu1 %v2556_v22 }
  0x81   :  { %996 = vmatprep.subr.bf16.mxu1 %v2759_v8 }
  0x84   :  { %997 = vmatpush1.bf16.msra.mxu1 %v2557_v23 }
  0x85   :  { %998 = vmatprep.subr.bf16.mxu1 %v2759_v8 }
  0xe1   :  { %v229_v24 = vpop.f32.mrb[0].mxu1 }
  0xe2   :  { %v2396_v26 = vpop.f32.mrb[1].mxu1 }
  0xe3   :  { %v232_v28 = vpop.f32.mrb[2].mxu1  ;;  %v2560_v26 = vld [vmem:[%s3647_s27 + $0x48] sm:$0xff]  }
  0xe4   :  { %v188_v25 = vpop.f32.mrb[0].mxu0  ;;  %v2397_v30 = vpop.f32.mrb[3].mxu1  ;;  %v2562_v28 = vld [vmem:[%s3647_s27 + $0x58] sm:$0xff]  }
  0xe5   :  { %v190_v27 = vpop.f32.mrb[1].mxu0 }
  0xe6   :  { %v192_v29 = vpop.f32.mrb[2].mxu0 }
  0xe7   :  { %v193_v31 = vpop.f32.mrb[3].mxu0  ;;  %v564_v29 = vld [vmem:[%s3615_s7] sm:$0x3] }
  0xe8   :  { %v569_v30 = vrot.slane %v564_v29, %v3121_v34  ;;  %v573_v31 = vrot.slane %v564_v29, %v3124_v35  ;;  %v2574_v29 = vld [vmem:[%s3622_s15 + $0x10] ss:$8 sps:$4 sm:$0xff]  }
 0x109   :  { %v474_v37 = vpop.f32.mrb[4].mxu1 }
 0x10a   :  { %v475_v39 = vadd.f32 %v474_v37, %v229_v24  ;;  %v476_v42 = vpop.f32.mrb[5].mxu1  ;;  %v2558_v24 = vld [vmem:[%s3647_s27 + $0x38] sm:$0xff]  }
 0x10b   :  { %v477_v46 = vpop.f32.mrb[6].mxu1  ;;  %999 = vmatpush1.bf16.msra.mxu1 %v2558_v24 }
 0x10c   :  { %v433_v40 = vpop.f32.mrb[4].mxu0  ;;  %v478_v49 = vpop.f32.mrb[7].mxu1  ;;  %v499_v56 = vadd.f32 %v493_v53, %v475_v39  ;;  %1000 = vmatprep.subr.bf16.mxu1 %v2759_v8 }
 0x10d   :  { %v434_v44 = vadd.f32 %v433_v40, %v188_v25  ;;  %v435_v45 = vpop.f32.mrb[5].mxu0  ;;  %v2559_v25 = vld [vmem:[%s3647_s27 + $0x40] sm:$0xff]  }
 0x10e   :  { %v436_v47 = vadd.f32 %v435_v45, %v190_v27  ;;  %v437_v48 = vpop.f32.mrb[6].mxu0  ;;  %v2204_v57 = vmul.f32 -1.442695, %v499_v56  ;;  %v2561_v27 = vld [vmem:[%s3647_s27 + $0x50] sm:$0xff]  }
 0x10f   :  { %v497_v50 = vadd.f32 %v485_v38, %v434_v44  ;;  %v438_v51 = vpop.f32.mrb[7].mxu0  ;;  %1001 = vmatpush1.bf16.msra.mxu1 %v2559_v25 }
 0x110   :  { %v498_v52 = vadd.f32 %v489_v41, %v436_v47  ;;  %1002 = vmatprep.subr.bf16.mxu1 %v2759_v8 }
 0x111   :  { %v2202_v54 = vmul.f32 -1.442695, %v497_v50 }
 0x112   :  { %v2203_v55 = vmul.f32 -1.442695, %v498_v52 }
 0x113   :  { %2703 = vpow2.f32 %v2202_v54  ;;  %1003 = vmatpush1.bf16.msra.mxu1 %v2560_v26  ;;  %v2563_v54 = vld [vmem:[%s3616_s10] sm:$0xff]  }
 0x114   :  { %2705 = vpow2.f32 %v2203_v55  ;;  %1004 = vmatprep.subr.bf16.mxu1 %v2759_v8  ;;  %v2564_v55 = vld [vmem:[%s3616_s10 + $0x8] sm:$0xff]  }
 0x115   :  { %2707 = vpow2.f32 %v2204_v57  ;;  %v2566_v57 = vld [vmem:[%s3616_s10 + $0x18] sm:$0xff]  }
 0x117   :  { %1005 = vmatpush1.bf16.msra.mxu1 %v2561_v27  ;;  %v2573_v27 = vld [vmem:[%s3622_s15 + $0x4] ss:$8 sps:$4 sm:$0xff]  }
 0x118   :  { %1006 = vmatprep.subr.bf16.mxu1 %v2759_v8 }
 0x11b   :  { %1007 = vmatpush1.bf16.msra.mxu1 %v2562_v28  ;;  %v2576_v28 = vld [vmem:[%s3622_s15 + $0x14] ss:$8 sps:$4 sm:$0xff]  }
 0x11c   :  { %2418 = vmatprep.subr.bf16.mxu1 %v2757_v0 }
 0x11d   :  { %v2704_v58 = vpop.eup %2703 }
 0x11e   :  { %v2706_v59 = vpop.eup %2705  ;;  %v509_v60 = vadd.f32 1.0, %v2704_v58  ;;  %v2567_v58 = vld [vmem:[%s3616_s10 + $0x20] sm:$0xff]  }
 0x11f   :  { %v510_v61 = vadd.f32 1.0, %v2706_v59  ;;  %v2708_v62 = vpop.eup %2707  ;;  %v2568_v59 = vld [vmem:[%s3616_s10 + $0x28] sm:$0xff]  }
 0x120   :  { %2709 = vrcp.f32 %v509_v60  ;;  %v511_v1 = vadd.f32 1.0, %v2708_v62  ;;  %v2569_v60 = vld [vmem:[%s3616_s10 + $0x30] sm:$0xff]   ;;  %v2248_v62 = vld [vmem:[%s3617_s9] ss:$0 sm:$0xff] }
 0x121   :  { %2711 = vrcp.f32 %v510_v61  ;;  %v2570_v61 = vld [vmem:[%s3616_s10 + $0x38] sm:$0xff]  }
 0x122   :  { %2713 = vrcp.f32 %v511_v1 }
 0x12a   :  { %v2710_v63 = vpop.eup %2709 }
 0x12b   :  { %v2712_v2 = vpop.eup %2711  ;;  %v3134_v3 = vmul.f32 %v2710_v63, %v497_v50 }
 0x12c   :  { %v3136_v4 = vmul.f32 %v2712_v2, %v498_v52  ;;  %v2714_v16 = vpop.eup %2713 }
 0x12d   :  { %v521_v9 = vpack.c.bf16 %v3134_v3, %v3134_v3  ;;  %v3164_v18 = vmul.f32 %v2714_v16, %v499_v56  ;;  %v2565_v56 = vld [vmem:[%s3616_s10 + $0x10] sm:$0xff]   ;;  %v1157_v16 = vld [vmem:[%s3618_s13] sm:$0x7] }
 0x12e   :  { %v522_v6 = vpack.c.bf16 %v3136_v4, %v3136_v4 }
 0x12f   :  { %v523_v19 = vpack.c.bf16 %v3164_v18, %v3164_v18 }
 0x130   :  { %812 = vmatprep.mubr.bf16.mxu0 %v522_v6 }
 0x131   :  { %813 = vmatmul.mubr.bf16.vlgmr.msra.gmra.mrb[8].mxu0 %v521_v9 }
 0x132   :  { %822 = vmatpush1.bf16.msra.mxu0 %v2539_v7  ;;  %853 = vmatprep.mubr.bf16.mxu0 %v2759_v8 }
 0x133   :  { %823 = vmatprep.subr.bf16.mxu0 %v2544_v10 }
 0x136   :  { %824 = vmatpush1.bf16.msra.mxu0 %v2542_v11 }
 0x137   :  { %825 = vmatprep.subr.bf16.mxu0 %v2547_v12 }
 0x13a   :  { %826 = vmatpush1.bf16.msra.mxu0 %v2545_v13 }
 0x13b   :  { %827 = vmatprep.subr.bf16.mxu0 %v2550_v15 }
 0x13e   :  { %828 = vmatpush1.bf16.msra.mxu0 %v2548_v17  ;;  %v1159_v17 = vand.u32 %v1157_v16, %v2883_v5  ;;  %v2263_v5 = vld [vmem:[%s3620_s11] ss:$0 sm:$0xff] }
 0x13f   :  { %2398 = vmatprep.subr.bf16.mxu0 %v2757_v0 }
 0x141   :  { %2245 = vmatmul.mubr.msk.bf16.vlgmr.msra.gmra.mrb[8].mxu0 %vm776_vm5, %v523_v19  ;;  %v1156_v19 = vld [vmem:[%s3619_s12] sm:$0x3] }
 0x142   :  { %2414 = vmatprep.mubr.msk.bf16.mxu0 %vm2760_vm2, %v2757_v0  ;;  %2399 = vmatpush3.bf16.msra.mxu0 %v2563_v54  ;;  %v1206_v20 = vsel %vm141_vm0, %v1156_v19, 0  ;;  %v2591_v54 = vld [vmem:[%s3622_s15 + $0x64] ss:$8 sps:$4 sm:$0xff]  }
 0x143   :  { %2400 = vmatprep.subr.bf16.mxu0 %v2757_v0  ;;  %v2606_v19 = vld [vmem:[%s3624_s17 + $0x38] ss:$12 sps:$4 sm:$0xff]  }
 0x146   :  { %2401 = vmatpush3.bf16.msra.mxu0 %v2564_v55  ;;  %v2589_v55 = vld [vmem:[%s3622_s15 + $0x60] ss:$8 sps:$4 sm:$0xff]  }
 0x147   :  { %2402 = vmatprep.subr.bf16.mxu0 %v2757_v0 }
 0x14a   :  { %2403 = vmatpush3.bf16.msra.mxu0 %v2565_v56  ;;  %v2594_v56 = vld [vmem:[%s3622_s15 + $0x74] ss:$8 sps:$4 sm:$0xff]  }
 0x14b   :  { %2404 = vmatprep.subr.bf16.mxu0 %v2757_v0 }
 0x14e   :  { %2405 = vmatpush3.bf16.msra.mxu0 %v2566_v57  ;;  %v2592_v57 = vld [vmem:[%s3622_s15 + $0x70] ss:$8 sps:$4 sm:$0xff]  }
 0x14f   :  { %2406 = vmatprep.subr.bf16.mxu0 %v2757_v0 }
 0x152   :  { %2407 = vmatpush3.bf16.msra.mxu0 %v2567_v58  ;;  %v2595_v58 = vld [vmem:[%s3624_s17] ss:$12 sps:$4 sm:$0xff]  }
 0x153   :  { %2408 = vmatprep.subr.bf16.mxu0 %v2757_v0 }
 0x156   :  { %2409 = vmatpush3.bf16.msra.mxu0 %v2568_v59  ;;  %v2597_v59 = vld [vmem:[%s3624_s17 + $0x4] ss:$12 sps:$4 sm:$0xff]  }
 0x157   :  { %2410 = vmatprep.subr.bf16.mxu0 %v2757_v0 }
 0x15a   :  { %2411 = vmatpush3.bf16.msra.mxu0 %v2569_v60  ;;  %v2601_v60 = vld [vmem:[%s3624_s17 + $0x1c] ss:$12 sps:$4 sm:$0xff]  }
 0x15b   :  { %2412 = vmatprep.subr.bf16.mxu0 %v2757_v0 }
 0x15e   :  { %2413 = vmatpush3.bf16.msra.mxu0 %v2570_v61  ;;  %v2599_v61 = vld [vmem:[%s3624_s17 + $0x18] ss:$12 sps:$4 sm:$0xff]  }
 0x15f   :  { %1366 = vmatprep.subr.bf16.mxu0 %v2573_v27  ;;  %v2622_v27 = vld [vmem:[%s3624_s17 + $0x98] ss:$12 sps:$4 sm:$0xff]  }
 0x214   :  { %v855_v32 = vpop.f32.mrb[8].mxu0 }
 0x215   :  { %v2430_v36 = vadd.f32 %v855_v32, %v569_v30  ;;  %v857_v37 = vpop.f32.mrb[9].mxu0  ;;  %v2577_v32 = vld [vmem:[%s3622_s15 + $0x20] ss:$8 sps:$4 sm:$0xff]  }
 0x216   :  { %v2431_v38 = vadd.f32 %v857_v37, %v573_v31  ;;  %v859_v39 = vpop.f32.mrb[10].mxu0  ;;  %v2579_v31 = vld [vmem:[%s3622_s15 + $0x24] ss:$8 sps:$4 sm:$0xff]   ;;  %v2580_v37 = vld [vmem:[%s3622_s15 + $0x30] ss:$8 sps:$4 sm:$0xff]  }
 0x217   :  { %v2246_v40 = vmul.f32 -1.442695, %v2430_v36  ;;  %v860_v41 = vpop.f32.mrb[11].mxu0  ;;  %v2583_v39 = vld [vmem:[%s3622_s15 + $0x40] ss:$8 sps:$4 sm:$0xff]  }
 0x218   :  { %v2247_v42 = vmul.f32 -1.442695, %v2431_v38  ;;  %v2586_v41 = vld [vmem:[%s3622_s15 + $0x50] ss:$8 sps:$4 sm:$0xff]  }
 0x219   :  { %2715 = vpow2.f32 %v2246_v40  ;;  %v2588_v40 = vld [vmem:[%s3622_s15 + $0x54] ss:$8 sps:$4 sm:$0xff]  }
 0x21a   :  { %2717 = vpow2.f32 %v2247_v42 }
 0x223   :  { %v2716_v44 = vpop.eup %2715 }
 0x224   :  { %v2718_v45 = vpop.eup %2717  ;;  %v868_v46 = vadd.f32 1.0, %v2716_v44 }
 0x225   :  { %v869_v47 = vadd.f32 1.0, %v2718_v45 }
 0x226   :  { %2719 = vrcp.f32 %v868_v46 }
 0x227   :  { %2721 = vrcp.f32 %v869_v47  ;;  %v1145_v47 = vld [vmem:[%s3623_s2] sm:$0x3] }
 0x230   :  { %v2720_v48 = vpop.eup %2719 }
 0x231   :  { %v2722_v49 = vpop.eup %2721  ;;  %v3213_v50 = vmul.f32 %v2720_v48, %v2430_v36  ;;  %v2582_v36 = vld [vmem:[%s3622_s15 + $0x34] ss:$8 sps:$4 sm:$0xff]  }
 0x232   :  { %v3215_v51 = vmul.f32 %v2722_v49, %v2431_v38  ;;  %v2585_v38 = vld [vmem:[%s3622_s15 + $0x44] ss:$8 sps:$4 sm:$0xff]  }
 0x233   :  { %v876_v53 = vpack.c.bf16 %v3213_v50, %v3213_v50 }
 0x234   :  { %v877_v52 = vpack.c.bf16 %v3215_v51, %v3215_v51 }
 0x236   :  { %2261 = vmatprep.mubr.msk.bf16.mxu1 %vm776_vm5, %v877_v52 }
 0x237   :  { %1017 = vmatmul.mubr.bf16.vlgmr.msra.gmra.mrb[8].mxu1 %v876_v53 }
 0x238   :  { %2420 = vmatprep.mubr.msk.bf16.mxu1 %vm2760_vm2, %v2757_v0  ;;  %2419 = vmatpush3.bf16.msra.mxu1 %v1159_v17  ;;  %v2602_v17 = vld [vmem:[%s3624_s17 + $0x20] ss:$12 sps:$4 sm:$0xff]  }
 0x239   :  { %2424 = vmatprep.subr.bf16.mxu1 %v2757_v0 }
 0x23f   :  { %2421 = vmatmul.mubr.msk.bf16.vlgmr.msra.gmra.mrb[12].mxu1 %vm137_vm3, %v2900_v14 }
 0x240   :  { %2425 = vmatpush3.bf16.msra.mxu1 %v1206_v20  ;;  %2426 = vmatprep.mubr.msk.bf16.mxu1 %vm2760_vm2, %v2757_v0  ;;  %v2571_v0 = vld [vmem:[%s3622_s15] ss:$8 sps:$4 sm:$0xff]  }
 0x241   :  { %1685 = vmatprep.subr.bf16.mxu1 %v2597_v59  ;;  %v2607_v20 = vld [vmem:[%s3624_s17 + $0x48] ss:$12 sps:$4 sm:$0xff]  }
 0x30a   :  { %v1018_v63 = vpop.f32.mrb[8].mxu1 }
 0x30b   :  { %v1019_v1 = vadd.f32 %v2248_v62, %v1018_v63  ;;  %v1020_v2 = vpop.f32.mrb[9].mxu1  ;;  %v2605_v62 = vld [vmem:[%s3624_s17 + $0x34] ss:$12 sps:$4 sm:$0xff]   ;;  %v2603_v63 = vld [vmem:[%s3624_s17 + $0x30] ss:$12 sps:$4 sm:$0xff]  }
 0x30c   :  { %v1021_v6 = vpop.f32.mrb[10].mxu1  ;;  %v2274_v2 = vld [vmem:[%s3625_s14] ss:$0 sm:$0xff] }
 0x30d   :  { %v2262_v7 = vmul.f32 -1.442695, %v1019_v1  ;;  %v1022_v9 = vpop.f32.mrb[11].mxu1 }
 0x30f   :  { %2723 = vpow2.f32 %v2262_v7 }
 0x312   :  { %v1195_v42 = vpop.f32.mrb[12].mxu1 }
 0x313   :  { %v2422_v44 = vpop.f32.mrb[13].mxu1 }
 0x314   :  { %v1198_v45 = vpop.f32.mrb[14].mxu1  ;;  %v2641_v44 = vld [vmem:[%s3624_s17 + $0x10c] ss:$12 sps:$4 sm:$0xff]  }
 0x315   :  { %v2423_v46 = vpop.f32.mrb[15].mxu1  ;;  %v2639_v45 = vld [vmem:[%s3624_s17 + $0x108] ss:$12 sps:$4 sm:$0xff]  }
 0x316   :  { %v2642_v46 = vld [vmem:[%s3624_s17 + $0x110] ss:$12 sps:$4 sm:$0xff]  }
 0x319   :  { %v2724_v10 = vpop.eup %2723 }
 0x31a   :  { %v1027_v11 = vadd.f32 1.0, %v2724_v10 }
 0x31c   :  { %2725 = vrcp.f32 %v1027_v11 }
 0x326   :  { %v2726_v12 = vpop.eup %2725 }
 0x327   :  { %v3258_v13 = vmul.f32 %v2726_v12, %v1019_v1 }
 0x329   :  { %v1031_v15 = vpack.c.bf16 %v3258_v13, %v3258_v13 }
 0x32b   :  { %2415 = vmatmul.mubr.bf16.vlgmr.msra.gmra.mrb[12].mxu0 %v1031_v15  ;;  %v2598_v15 = vld [vmem:[%s3624_s17 + $0x8] ss:$12 sps:$4 sm:$0xff]  }
 0x32c   :  { %1398 = vmatprep.mubr.bf16.mxu0 %v2759_v8  ;;  %1367 = vmatpush1.bf16.msra.mxu0 %v2571_v0  ;;  %v2619_v0 = vld [vmem:[%s3624_s17 + $0x90] ss:$12 sps:$4 sm:$0xff]  }
 0x32d   :  { %1368 = vmatprep.subr.bf16.mxu0 %v2576_v28  ;;  %v2625_v28 = vld [vmem:[%s3624_s17 + $0xac] ss:$12 sps:$4 sm:$0xff]  }
 0x330   :  { %1369 = vmatpush1.bf16.msra.mxu0 %v2574_v29  ;;  %v2623_v29 = vld [vmem:[%s3624_s17 + $0xa8] ss:$12 sps:$4 sm:$0xff]  }
 0x331   :  { %1370 = vmatprep.subr.bf16.mxu0 %v2579_v31  ;;  %v2629_v31 = vld [vmem:[%s3624_s17 + $0xc4] ss:$12 sps:$4 sm:$0xff]  }
 0x334   :  { %1371 = vmatpush1.bf16.msra.mxu0 %v2577_v32  ;;  %v2627_v32 = vld [vmem:[%s3624_s17 + $0xc0] ss:$12 sps:$4 sm:$0xff]  }
 0x335   :  { %1372 = vmatprep.subr.bf16.mxu0 %v2582_v36  ;;  %v2630_v36 = vld [vmem:[%s3624_s17 + $0xc8] ss:$12 sps:$4 sm:$0xff]  }
 0x338   :  { %1373 = vmatpush1.bf16.msra.mxu0 %v2580_v37  ;;  %v2633_v37 = vld [vmem:[%s3624_s17 + $0xdc] ss:$12 sps:$4 sm:$0xff]  }
 0x339   :  { %1374 = vmatprep.subr.bf16.mxu0 %v2585_v38  ;;  %v2631_v38 = vld [vmem:[%s3624_s17 + $0xd8] ss:$12 sps:$4 sm:$0xff]  }
 0x33c   :  { %1375 = vmatpush1.bf16.msra.mxu0 %v2583_v39  ;;  %v2634_v39 = vld [vmem:[%s3624_s17 + $0xe0] ss:$12 sps:$4 sm:$0xff]  }
 0x33d   :  { %1376 = vmatprep.subr.bf16.mxu0 %v2588_v40  ;;  %v2637_v40 = vld [vmem:[%s3624_s17 + $0xf4] ss:$12 sps:$4 sm:$0xff]  }
 0x340   :  { %1377 = vmatpush1.bf16.msra.mxu0 %v2586_v41  ;;  %v2635_v41 = vld [vmem:[%s3624_s17 + $0xf0] ss:$12 sps:$4 sm:$0xff]  }
 0x341   :  { %1378 = vmatprep.subr.bf16.mxu0 %v2591_v54 }
 0x344   :  { %1379 = vmatpush1.bf16.msra.mxu0 %v2589_v55 }
 0x345   :  { %1380 = vmatprep.subr.bf16.mxu0 %v2594_v56 }
 0x348   :  { %1381 = vmatpush1.bf16.msra.mxu0 %v2592_v57 }
 0x349   :  { %1726 = vmatprep.subr.bf16.mxu0 %v2759_v8 }
 0x3fe   :  { %v1137_v21 = vpop.f32.mrb[12].mxu0 }
 0x3ff   :  { %v1138_v22 = vadd.f32 %v2263_v5, %v1137_v21  ;;  %v2416_v23 = vpop.f32.mrb[13].mxu0  ;;  %v2610_v5 = vld [vmem:[%s3624_s17 + $0x50] ss:$12 sps:$4 sm:$0xff]  }
 0x400   :  { %v1140_v24 = vpop.f32.mrb[14].mxu0  ;;  %v2613_v21 = vld [vmem:[%s3624_s17 + $0x64] ss:$12 sps:$4 sm:$0xff]   ;;  %v2614_v23 = vld [vmem:[%s3624_s17 + $0x68] ss:$12 sps:$4 sm:$0xff]  }
 0x401   :  { %1144 = vst.msk [vmem:[%s3621_s22] sm:$0x3] %vm1143_vm6, %v1138_v22  ;;  %v1146_v25 = vmul.f32 0.5, %v1138_v22  ;;  %v2417_v26 = vpop.f32.mrb[15].mxu0  ;;  %v2617_v24 = vld [vmem:[%s3624_s17 + $0x7c] ss:$12 sps:$4 sm:$0xff]  }
 0x402   :  { %v2618_v26 = vld [vmem:[%s3624_s17 + $0x80] ss:$12 sps:$4 sm:$0xff]  }
 0x403   :  { %v1147_v14 = vmul.f32 1.442695, %v1146_v25  ;;  %v2615_v25 = vld [vmem:[%s3624_s17 + $0x78] ss:$12 sps:$4 sm:$0xff]  }
 0x405   :  { %2727 = vpow2.f32 %v1147_v14  ;;  %v2621_v14 = vld [vmem:[%s3624_s17 + $0x94] ss:$12 sps:$4 sm:$0xff]  }
 0x40f   :  { %v2728_v30 = vpop.eup %2727 }
 0x410   :  { %1150 = vrot.lane.b32.xlu0 %v2728_v30, %s2761_s26  ;;  %v2626_v30 = vld [vmem:[%s3624_s17 + $0xb0] ss:$12 sps:$4 sm:$0xff]  }
 0x482   :  { %v1151_v48 = vpop.permute.xlu0 %1150 }
 0x483   :  { %v1153_v49 = vmul.f32 %v1151_v48, %v1145_v47  ;;  %v2645_v47 = vld [vmem:[%s3626_s19 + $0x4] ss:$8 sps:$4 sm:$0xff]   ;;  %v1274_v48 = vld [vmem:[%s3627_s16] sm:$0x3] }
 0x485   :  { %v1154_v52 = vadd.f32 %v1153_v49, %v1138_v22  ;;  %v2611_v22 = vld [vmem:[%s3624_s17 + $0x60] ss:$12 sps:$4 sm:$0xff]   ;;  %v1279_v49 = vrot.slane %v1274_v48, %v3121_v34 }
 0x487   :  { %v1155_v53 = vpack.c.bf16 %v1154_v52, %v1154_v52  ;;  %v1283_v52 = vrot.slane %v1274_v48, %v3124_v35 }
 0x489   :  { %2427 = vmatmul.mubr.msk.bf16.vlgmr.msra.gmra.mrb[16].mxu1 %vm1201_vm7, %v1155_v53 }
 0x48a   :  { %1686 = vmatpush1.bf16.msra.mxu1 %v2595_v58 }
 0x48b   :  { %1687 = vmatprep.subr.bf16.mxu1 %v2601_v60 }
 0x48e   :  { %1688 = vmatpush1.bf16.msra.mxu1 %v2599_v61 }
 0x48f   :  { %1689 = vmatprep.subr.bf16.mxu1 %v2605_v62 }
 0x492   :  { %1690 = vmatpush1.bf16.msra.mxu1 %v2603_v63 }
 0x55c   :  { %v1242_v1 = vpop.f32.mrb[16].mxu1 }
 0x55d   :  { %v1243_v6 = vadd.f32 %v1242_v1, %v1195_v42  ;;  %v2428_v7 = vpop.f32.mrb[17].mxu1  ;;  %v2638_v42 = vld [vmem:[%s3624_s17 + $0xf8] ss:$12 sps:$4 sm:$0xff]  }
 0x55e   :  { %v1245_v9 = vpop.f32.mrb[18].mxu1 }
 0x55f   :  { %v1255_v10 = vadd.f32 %v2274_v2, %v1243_v6  ;;  %v2429_v11 = vpop.f32.mrb[19].mxu1 }
 0x561   :  { %v1256_v12 = vadd.f32 %v1255_v10, %v3258_v13  ;;  %v2609_v13 = vld [vmem:[%s3624_s17 + $0x4c] ss:$12 sps:$4 sm:$0xff]  }
 0x562   :  { %1691 = vmatprep.subr.bf16.mxu1 %v2609_v13  ;;  %v2654_v13 = vld [vmem:[%s3626_s19 + $0x34] ss:$8 sps:$4 sm:$0xff]  }
 0x563   :  { %v1257_v16 = vpack.c.bf16 %v1256_v12, %v1256_v12  ;;  %1692 = vmatpush1.bf16.msra.mxu1 %v2607_v20  ;;  %v2652_v20 = vld [vmem:[%s3626_s19 + $0x30] ss:$8 sps:$4 sm:$0xff]  }
 0x564   :  { %1693 = vmatprep.subr.bf16.mxu1 %v2613_v21  ;;  %v2655_v21 = vld [vmem:[%s3626_s19 + $0x40] ss:$8 sps:$4 sm:$0xff]  }
 0x565   :  { %1399 = vmatmul.mubr.bf16.vlgmr.msra.gmra.mrb[16].mxu0 %v1257_v16 }
 0x566   :  { %1727 = vmatpush1.bf16.msra.mxu0 %v2598_v15  ;;  %v2643_v15 = vld [vmem:[%s3626_s19] ss:$8 sps:$4 sm:$0xff]  }
 0x567   :  { %1728 = vmatprep.subr.bf16.mxu0 %v2759_v8  ;;  %1694 = vmatpush1.bf16.msra.mxu1 %v2611_v22  ;;  %v2660_v22 = vld [vmem:[%s3626_s19 + $0x54] ss:$8 sps:$4 sm:$0xff]  }
 0x568   :  { %1695 = vmatprep.subr.bf16.mxu1 %v2617_v24  ;;  %v2663_v24 = vld [vmem:[%s3626_s19 + $0x64] ss:$8 sps:$4 sm:$0xff]  }
 0x56a   :  { %1729 = vmatpush1.bf16.msra.mxu0 %v2602_v17  ;;  %v2648_v17 = vld [vmem:[%s3626_s19 + $0x14] ss:$8 sps:$4 sm:$0xff]  }
 0x56b   :  { %1730 = vmatprep.subr.bf16.mxu0 %v2759_v8  ;;  %1696 = vmatpush1.bf16.msra.mxu1 %v2615_v25  ;;  %v2661_v25 = vld [vmem:[%s3626_s19 + $0x60] ss:$8 sps:$4 sm:$0xff]  }
 0x56c   :  { %1697 = vmatprep.subr.bf16.mxu1 %v2621_v14  ;;  %v2664_v14 = vld [vmem:[%s3626_s19 + $0x70] ss:$8 sps:$4 sm:$0xff]  }
 0x56e   :  { %1731 = vmatpush1.bf16.msra.mxu0 %v2606_v19  ;;  %v2649_v19 = vld [vmem:[%s3626_s19 + $0x20] ss:$8 sps:$4 sm:$0xff]  }
 0x56f   :  { %1732 = vmatprep.subr.bf16.mxu0 %v2759_v8  ;;  %1698 = vmatpush1.bf16.msra.mxu1 %v2619_v0  ;;  %v2669_v0 = vld [vmem:[%s3626_s19 + $0x84] ss:$8 sps:$4 sm:$0xff]  }
 0x570   :  { %1699 = vmatprep.subr.bf16.mxu1 %v2625_v28  ;;  %v2672_v28 = vld [vmem:[%s3626_s19 + $0x94] ss:$8 sps:$4 sm:$0xff]  }
 0x572   :  { %1733 = vmatpush1.bf16.msra.mxu0 %v2610_v5  ;;  %v2657_v5 = vld [vmem:[%s3626_s19 + $0x44] ss:$8 sps:$4 sm:$0xff]  }
 0x573   :  { %1734 = vmatprep.subr.bf16.mxu0 %v2759_v8  ;;  %1700 = vmatpush1.bf16.msra.mxu1 %v2623_v29  ;;  %v2670_v29 = vld [vmem:[%s3626_s19 + $0x90] ss:$8 sps:$4 sm:$0xff]  }
 0x574   :  { %1701 = vmatprep.subr.bf16.mxu1 %v2629_v31  ;;  %v2673_v31 = vld [vmem:[%s3626_s19 + $0xa0] ss:$8 sps:$4 sm:$0xff]  }
 0x576   :  { %1735 = vmatpush1.bf16.msra.mxu0 %v2614_v23  ;;  %v2658_v23 = vld [vmem:[%s3626_s19 + $0x50] ss:$8 sps:$4 sm:$0xff]  }
 0x577   :  { %1736 = vmatprep.subr.bf16.mxu0 %v2759_v8  ;;  %1702 = vmatpush1.bf16.msra.mxu1 %v2627_v32  ;;  %v2678_v32 = vld [vmem:[%s3626_s19 + $0xb4] ss:$8 sps:$4 sm:$0xff]  }
 0x578   :  { %1703 = vmatprep.subr.bf16.mxu1 %v2633_v37  ;;  %v2681_v37 = vld [vmem:[%s3626_s19 + $0xc4] ss:$8 sps:$4 sm:$0xff]  }
 0x57a   :  { %1737 = vmatpush1.bf16.msra.mxu0 %v2618_v26  ;;  %v2666_v26 = vld [vmem:[%s3626_s19 + $0x74] ss:$8 sps:$4 sm:$0xff]  }
 0x57b   :  { %1738 = vmatprep.subr.bf16.mxu0 %v2759_v8  ;;  %1704 = vmatpush1.bf16.msra.mxu1 %v2631_v38  ;;  %v2679_v38 = vld [vmem:[%s3626_s19 + $0xc0] ss:$8 sps:$4 sm:$0xff]  }
 0x57c   :  { %1705 = vmatprep.subr.bf16.mxu1 %v2637_v40  ;;  %v2682_v40 = vld [vmem:[%s3626_s19 + $0xd0] ss:$8 sps:$4 sm:$0xff]  }
 0x57e   :  { %1739 = vmatpush1.bf16.msra.mxu0 %v2622_v27  ;;  %v2667_v27 = vld [vmem:[%s3626_s19 + $0x80] ss:$8 sps:$4 sm:$0xff]  }
 0x57f   :  { %1740 = vmatprep.subr.bf16.mxu0 %v2759_v8  ;;  %1706 = vmatpush1.bf16.msra.mxu1 %v2635_v41  ;;  %v2687_v41 = vld [vmem:[%s3626_s19 + $0xe4] ss:$8 sps:$4 sm:$0xff]  }
 0x580   :  { %1707 = vmatprep.subr.bf16.mxu1 %v2641_v44  ;;  %v2690_v44 = vld [vmem:[%s3626_s19 + $0xf4] ss:$8 sps:$4 sm:$0xff]  }
 0x582   :  { %1741 = vmatpush1.bf16.msra.mxu0 %v2626_v30  ;;  %v2675_v30 = vld [vmem:[%s3626_s19 + $0xa4] ss:$8 sps:$4 sm:$0xff]  }
 0x583   :  { %1742 = vmatprep.subr.bf16.mxu0 %v2759_v8  ;;  %1708 = vmatpush1.bf16.msra.mxu1 %v2639_v45  ;;  %v2688_v45 = vld [vmem:[%s3626_s19 + $0xf0] ss:$8 sps:$4 sm:$0xff]  }
 0x584   :  { %2048 = vmatprep.subr.bf16.mxu1 %v2645_v47  ;;  %v1473_v47 = vld [vmem:[%s3628_s18] sm:$0x7] }
 0x585   :  { %v1478_v48 = vrot.slane %v1473_v47, %v3121_v34 }
 0x586   :  { %1743 = vmatpush1.bf16.msra.mxu0 %v2630_v36  ;;  %v2676_v36 = vld [vmem:[%s3626_s19 + $0xb0] ss:$8 sps:$4 sm:$0xff]  }
 0x587   :  { %1744 = vmatprep.subr.bf16.mxu0 %v2759_v8 }
 0x58a   :  { %1745 = vmatpush1.bf16.msra.mxu0 %v2634_v39  ;;  %v2684_v39 = vld [vmem:[%s3626_s19 + $0xd4] ss:$8 sps:$4 sm:$0xff]  }
 0x58b   :  { %1746 = vmatprep.subr.bf16.mxu0 %v2759_v8 }
 0x58e   :  { %1747 = vmatpush1.bf16.msra.mxu0 %v2638_v42  ;;  %v2685_v42 = vld [vmem:[%s3626_s19 + $0xe0] ss:$8 sps:$4 sm:$0xff]  }
 0x58f   :  { %1748 = vmatprep.subr.bf16.mxu0 %v2759_v8 }
 0x592   :  { %1749 = vmatpush1.bf16.msra.mxu0 %v2642_v46  ;;  %v2693_v46 = vld [vmem:[%s3626_s19 + $0x104] ss:$8 sps:$4 sm:$0xff]  }
 0x638   :  { %v1400_v53 = vpop.f32.mrb[16].mxu0 }
 0x639   :  { %v1401_v54 = vadd.f32 %v1400_v53, %v1279_v49  ;;  %v1402_v55 = vpop.f32.mrb[17].mxu0  ;;  %v1482_v49 = vrot.slane %v1473_v47, %v3124_v35 }
 0x63a   :  { %v1403_v56 = vadd.f32 %v1402_v55, %v1283_v52  ;;  %v1404_v57 = vpop.f32.mrb[18].mxu0 }
 0x63b   :  { %v2291_v58 = vmul.f32 -1.442695, %v1401_v54  ;;  %v1405_v59 = vpop.f32.mrb[19].mxu0  ;;  %v1486_v57 = vrot.slane %v1473_v47, %v492_v43 }
 0x63c   :  { %v2292_v60 = vmul.f32 -1.442695, %v1403_v56 }
 0x63d   :  { %2729 = vpow2.f32 %v2291_v58 }
 0x63e   :  { %2731 = vpow2.f32 %v2292_v60 }
 0x647   :  { %v2730_v61 = vpop.eup %2729 }
 0x648   :  { %v2732_v62 = vpop.eup %2731  ;;  %v1413_v63 = vadd.f32 1.0, %v2730_v61 }
 0x649   :  { %v1414_v1 = vadd.f32 1.0, %v2732_v62 }
 0x64a   :  { %2733 = vrcp.f32 %v1413_v63 }
 0x64b   :  { %2735 = vrcp.f32 %v1414_v1 }
 0x654   :  { %v2734_v2 = vpop.eup %2733 }
 0x655   :  { %v2736_v6 = vpop.eup %2735  ;;  %v1419_v7 = vmul.f32 %v2734_v2, %v1401_v54 }
 0x656   :  { %v1420_v9 = vmul.f32 %v2736_v6, %v1403_v56 }
 0x657   :  { %v1421_v10 = vadd.f32 %v1419_v7, %v3213_v50  ;;  %v2646_v50 = vld [vmem:[%s3626_s19 + $0x10] ss:$8 sps:$4 sm:$0xff]  }
 0x658   :  { %v1422_v11 = vadd.f32 %v1420_v9, %v3215_v51  ;;  %v2651_v51 = vld [vmem:[%s3626_s19 + $0x24] ss:$8 sps:$4 sm:$0xff]  }
 0x659   :  { %v1423_v16 = vpack.c.bf16 %v1421_v10, %v1421_v10 }
 0x65a   :  { %v1424_v12 = vpack.c.bf16 %v1422_v11, %v1422_v11 }
 0x65c   :  { %2329 = vmatprep.mubr.msk.bf16.mxu1 %vm776_vm5, %v1424_v12  ;;  %2330 = vmatprep.mubr.msk.bf16.mxu0 %vm776_vm5, %v1424_v12 }
 0x65d   :  { %1718 = vmatmul.mubr.bf16.vlgmr.msra.gmra.mrb[20].mxu1 %v1423_v16  ;;  %1759 = vmatmul.mubr.bf16.vlgmr.msra.gmra.mrb[20].mxu0 %v1423_v16 }
 0x65e   :  { %2049 = vmatpush1.bf16.msra.mxu1 %v2643_v15 }
 0x65f   :  { %2050 = vmatprep.subr.bf16.mxu1 %v2648_v17 }
 0x662   :  { %2051 = vmatpush1.bf16.msra.mxu1 %v2646_v50 }
 0x663   :  { %2052 = vmatprep.subr.bf16.mxu1 %v2651_v51 }
 0x666   :  { %2053 = vmatpush1.bf16.msra.mxu1 %v2649_v19 }
 0x667   :  { %2054 = vmatprep.subr.bf16.mxu1 %v2654_v13 }
 0x66a   :  { %2055 = vmatpush1.bf16.msra.mxu1 %v2652_v20  ;;  %v2691_v20 = vld [vmem:[%s3626_s19 + $0x100] ss:$8 sps:$4 sm:$0xff]  }
 0x66b   :  { %2056 = vmatprep.subr.bf16.mxu1 %v2657_v5 }
 0x66e   :  { %2057 = vmatpush1.bf16.msra.mxu1 %v2655_v21  ;;  %v2696_v21 = vld [vmem:[%s3626_s19 + $0x114] ss:$8 sps:$4 sm:$0xff]  }
 0x66f   :  { %2058 = vmatprep.subr.bf16.mxu1 %v2660_v22  ;;  %v2694_v22 = vld [vmem:[%s3626_s19 + $0x110] ss:$8 sps:$4 sm:$0xff]  }
 0x672   :  { %2059 = vmatpush1.bf16.msra.mxu1 %v2658_v23  ;;  %v2697_v23 = vld [vmem:[%s3626_s19 + $0x120] ss:$8 sps:$4 sm:$0xff]  }
 0x673   :  { %2060 = vmatprep.subr.bf16.mxu1 %v2663_v24 }
 0x676   :  { %2061 = vmatpush1.bf16.msra.mxu1 %v2661_v25  ;;  %v2702_v25 = vld [vmem:[%s3626_s19 + $0x134] ss:$8 sps:$4 sm:$0xff]  }
 0x677   :  { %2062 = vmatprep.subr.bf16.mxu1 %v2666_v26 }
 0x67a   :  { %2063 = vmatpush1.bf16.msra.mxu1 %v2664_v14 }
 0x67b   :  { %2064 = vmatprep.subr.bf16.mxu1 %v2669_v0  ;;  %v1833_v0 = vld [vmem:[%s3629_s20] sm:$0x3] }
 0x67e   :  { %2065 = vmatpush1.bf16.msra.mxu1 %v2667_v27  ;;  %v1838_v27 = vrot.slane %v1833_v0, %v3121_v34 }
 0x67f   :  { %2066 = vmatprep.subr.bf16.mxu1 %v2672_v28  ;;  %v1842_v28 = vrot.slane %v1833_v0, %v3124_v35 }
 0x682   :  { %2067 = vmatpush1.bf16.msra.mxu1 %v2670_v29 }
 0x683   :  { %2068 = vmatprep.subr.bf16.mxu1 %v2675_v30 }
 0x686   :  { %2069 = vmatpush1.bf16.msra.mxu1 %v2673_v31 }
 0x687   :  { %2070 = vmatprep.subr.bf16.mxu1 %v2678_v32 }
 0x68a   :  { %2071 = vmatpush1.bf16.msra.mxu1 %v2676_v36 }
 0x68b   :  { %2072 = vmatprep.subr.bf16.mxu1 %v2681_v37 }
 0x68e   :  { %2073 = vmatpush1.bf16.msra.mxu1 %v2679_v38 }
 0x68f   :  { %2074 = vmatprep.subr.bf16.mxu1 %v2684_v39 }
 0x692   :  { %2075 = vmatpush1.bf16.msra.mxu1 %v2682_v40 }
 0x693   :  { %2076 = vmatprep.subr.bf16.mxu1 %v2687_v41 }
 0x696   :  { %2077 = vmatpush1.bf16.msra.mxu1 %v2685_v42 }
 0x697   :  { %2078 = vmatprep.subr.bf16.mxu1 %v2690_v44  ;;  %v2762_v44 = vmov 1983009808  }
 0x698   :  { %v2146_v34 = vunpack.c.l.s4 %v2762_v44 }
 0x69a   :  { %2079 = vmatpush1.bf16.msra.mxu1 %v2688_v45  ;;  %v2147_v45 = vunpack.c.0.s8 %v2146_v34 }
 0x69b   :  { %2089 = vmatprep.subr.bf16.mxu1 %v2693_v46 }
 0x69c   :  { %v2150_v46 = vsub.s32 %v2147_v45, %v3118_v33 }
 0x730   :  { %v1719_v52 = vpop.f32.mrb[20].mxu1  ;;  %v1760_v53 = vpop.f32.mrb[20].mxu0 }
 0x731   :  { %v1720_v54 = vadd.f32 %v1719_v52, %v1478_v48  ;;  %v1721_v55 = vpop.f32.mrb[21].mxu1  ;;  %v1762_v56 = vpop.f32.mrb[21].mxu0  ;;  %v1761_v2 = vadd.f32 %v1760_v53, %v1486_v57 }
 0x732   :  { %v1722_v58 = vadd.f32 %v1721_v55, %v1482_v49  ;;  %v1723_v59 = vpop.f32.mrb[22].mxu1  ;;  %v1763_v60 = vpop.f32.mrb[22].mxu0 }
 0x733   :  { %v2331_v61 = vmul.f32 -1.442695, %v1720_v54  ;;  %v1724_v62 = vpop.f32.mrb[23].mxu1  ;;  %v1764_v63 = vpop.f32.mrb[23].mxu0  ;;  %v2333_v6 = vmul.f32 -1.442695, %v1761_v2 }
 0x734   :  { %v2332_v1 = vmul.f32 -1.442695, %v1722_v58 }
 0x735   :  { %2737 = vpow2.f32 %v2331_v61 }
 0x736   :  { %2739 = vpow2.f32 %v2332_v1 }
 0x737   :  { %2741 = vpow2.f32 %v2333_v6 }
 0x73f   :  { %v2738_v7 = vpop.eup %2737 }
 0x740   :  { %v1775_v9 = vadd.f32 1.0, %v2738_v7  ;;  %v2740_v10 = vpop.eup %2739 }
 0x741   :  { %v1776_v11 = vadd.f32 1.0, %v2740_v10  ;;  %v2742_v12 = vpop.eup %2741 }
 0x742   :  { %2743 = vrcp.f32 %v1775_v9  ;;  %v1777_v43 = vadd.f32 1.0, %v2742_v12 }
 0x743   :  { %2745 = vrcp.f32 %v1776_v11 }
 0x744   :  { %2747 = vrcp.f32 %v1777_v43 }
 0x74c   :  { %v2744_v15 = vpop.eup %2743 }
 0x74d   :  { %v1784_v16 = vmul.f32 %v2744_v15, %v1720_v54  ;;  %v2746_v17 = vpop.eup %2745 }
 0x74e   :  { %v1785_v50 = vmul.f32 %v2746_v17, %v1722_v58 }
 0x74f   :  { %v1787_v51 = vadd.f32 %v1784_v16, %v3134_v3  ;;  %v2699_v3 = vld [vmem:[%s3626_s19 + $0x124] ss:$8 sps:$4 sm:$0xff]  }
 0x750   :  { %v1788_v19 = vadd.f32 %v1785_v50, %v3136_v4  ;;  %v2748_v4 = vpop.eup %2747 }
 0x751   :  { %v1790_v5 = vpack.c.bf16 %v1787_v51, %v1787_v51  ;;  %v1786_v24 = vmul.f32 %v2748_v4, %v1761_v2 }
 0x752   :  { %v1791_v13 = vpack.c.bf16 %v1788_v19, %v1788_v19 }
 0x753   :  { %v1789_v26 = vadd.f32 %v1786_v24, %v3164_v18 }
 0x754   :  { %2080 = vmatprep.mubr.bf16.mxu1 %v1791_v13 }
 0x755   :  { %2081 = vmatmul.mubr.bf16.vlgmr.msra.gmra.mrb[24].mxu1 %v1790_v5  ;;  %v1792_v14 = vpack.c.bf16 %v1789_v26, %v1789_v26 }
 0x756   :  { %2090 = vmatpush1.bf16.msra.mxu1 %v2691_v20  ;;  %2121 = vmatprep.mubr.bf16.mxu1 %v2759_v8  ;;  %v2700_v8 = vld [vmem:[%s3626_s19 + $0x130] ss:$8 sps:$4 sm:$0xff]  }
 0x757   :  { %2091 = vmatprep.subr.bf16.mxu1 %v2696_v21 }
 0x75a   :  { %2092 = vmatpush1.bf16.msra.mxu1 %v2694_v22 }
 0x75b   :  { %2093 = vmatprep.subr.bf16.mxu1 %v2699_v3 }
 0x75e   :  { %2094 = vmatpush1.bf16.msra.mxu1 %v2697_v23 }
 0x75f   :  { %2095 = vmatprep.subr.bf16.mxu1 %v2702_v25 }
 0x762   :  { %2096 = vmatpush1.bf16.msra.mxu1 %v2700_v8 }
 0x765   :  { %2374 = vmatmul.mubr.msk.bf16.vlgmr.msra.gmra.mrb[24].mxu1 %vm776_vm5, %v1792_v14 }
 0x838   :  { %v2123_v29 = vpop.f32.mrb[24].mxu1 }
 0x839   :  { %v2432_v30 = vadd.f32 %v2123_v29, %v1838_v27  ;;  %v2125_v31 = vpop.f32.mrb[25].mxu1 }
 0x83a   :  { %v2433_v32 = vadd.f32 %v2125_v31, %v1842_v28  ;;  %v2127_v36 = vpop.f32.mrb[26].mxu1 }
 0x83b   :  { %v2375_v37 = vmul.f32 -1.442695, %v2432_v30  ;;  %v2128_v18 = vpop.f32.mrb[27].mxu1 }
 0x83c   :  { %v2376_v38 = vmul.f32 -1.442695, %v2433_v32 }
 0x83d   :  { %2749 = vpow2.f32 %v2375_v37 }
 0x83e   :  { %2751 = vpow2.f32 %v2376_v38 }
 0x847   :  { %v2750_v39 = vpop.eup %2749 }
 0x848   :  { %v2752_v40 = vpop.eup %2751  ;;  %v2136_v41 = vadd.f32 1.0, %v2750_v39 }
 0x849   :  { %v2137_v42 = vadd.f32 1.0, %v2752_v40 }
 0x84a   :  { %2753 = vrcp.f32 %v2136_v41 }
 0x84b   :  { %2755 = vrcp.f32 %v2137_v42 }
 0x854   :  { %v2754_v35 = vpop.eup %2753 }
 0x855   :  { %v2756_v47 = vpop.eup %2755 }
 0x856   :  { %v2144_v48 = vcombine.low %v2754_v35, %v2756_v47 }
 0x858   :  { %v2151_v49 = vrot.slane %v2144_v48, %v2150_v46 }
 0x85a   :  { %2155 = vst.msk [vmem:[%s3630_s21] sm:$0xf] %vm2154_vm9, %v2151_v49 }

</bundles_post_ra>
